<compile_context>
chip_gen: v6e
topology: v6e:2x2x1
jax: 0.10.0
libtpu: 0.0.40
codegen_flags: <defaults>
</compile_context>

<pallas_src>
import jax
import jax.numpy as jnp
from jax.experimental import pallas as pl
from jax.experimental.pallas import tpu as pltpu

INPUT_SIZE = 99 * 7 * 7   # 4851 — hard-coded by the module's forward()
INPUT_PAD = 4864          # next multiple of 128 for clean lane tiling
HIDDEN1 = 128
HIDDEN2 = 64
NUM_CLASSES = 10
OUT_PAD = 128             # lane-dense output block; real logits are [:, :10]


def _round_up(x, m):
    return (x + m - 1) // m * m


def _mlp_kernel(x_ref, w1_ref, b1_ref, w2_ref, b2_ref, w3_ref, b3_ref, o_ref):
    # fc1: bf16 x / bf16 W1 on the MXU, f32 accumulation; bias + ReLU in f32.
    h1 = jnp.dot(x_ref[...], w1_ref[...], preferred_element_type=jnp.float32)
    h1 = jnp.maximum(h1 + b1_ref[...], 0.0)
    # fc2 + ReLU (tiny, f32 throughout)
    h2 = jnp.dot(h1, w2_ref[...], preferred_element_type=jnp.float32)
    h2 = jnp.maximum(h2 + b2_ref[...], 0.0)
    # fc3 (logits, lane-dense 128-wide padded output block)
    out = jnp.dot(h2, w3_ref[...], preferred_element_type=jnp.float32)
    o_ref[...] = (out + b3_ref[...]).astype(o_ref.dtype)


def prepare_params(raw_params):
    """Pad / cast (in, out)-layout f32 params into the kernel's layout.

    W1: zero-padded rows 4851->4864, cast to bf16 (halves dominant HBM traffic).
    W3/b3: zero-padded columns 10->128 so the output block is lane-dense.
    """
    w1, b1, w2, b2, w3, b3 = raw_params
    w1p = jnp.zeros((INPUT_PAD, HIDDEN1), jnp.float32).at[:INPUT_SIZE].set(w1)
    w1p = w1p.astype(jnp.bfloat16)
    w3p = jnp.zeros((HIDDEN2, OUT_PAD), jnp.float32).at[:, :NUM_CLASSES].set(w3)
    b3p = jnp.zeros((1, OUT_PAD), jnp.float32).at[:, :NUM_CLASSES].set(b3)
    return w1p, b1, w2, b2, w3p, b3p


def dnn_forward(x, kernel_params, *, tm=512):
    """x: float32 (B, 99, 7, 7) NCHW. Returns (B, NUM_CLASSES) float32 logits."""
    w1, b1, w2, b2, w3, b3 = kernel_params
    B = x.shape[0]

    # Flatten (== torch .view), cast to bf16, pad features to the 128-lane boundary.
    x_flat = x.reshape(B, INPUT_SIZE).astype(jnp.bfloat16)
    x_flat = jnp.pad(x_flat, ((0, 0), (0, INPUT_PAD - INPUT_SIZE)))

    # Batch tiling: tm rows per grid step (sublane-aligned); pad B to a tile multiple.
    tm = min(tm, _round_up(B, 8))
    b_pad = _round_up(B, tm)
    if b_pad != B:
        x_flat = jnp.pad(x_flat, ((0, b_pad - B), (0, 0)))
    n_tiles = b_pad // tm

    const = lambda shape: pl.BlockSpec(shape, lambda i: (0, 0))  # VMEM-resident weights

    out = pl.pallas_call(
        _mlp_kernel,
        out_shape=jax.ShapeDtypeStruct((b_pad, OUT_PAD), jnp.float32),
        grid_spec=pltpu.PrefetchScalarGridSpec(
            num_scalar_prefetch=0,
            grid=(n_tiles,),
            in_specs=[
                pl.BlockSpec((tm, INPUT_PAD), lambda i: (i, 0)),  # x tile (pipelined)
                const((INPUT_PAD, HIDDEN1)),                      # W1 (bf16, resident)
                const((1, HIDDEN1)),                              # b1
                const((HIDDEN1, HIDDEN2)),                        # W2
                const((1, HIDDEN2)),                              # b2
                const((HIDDEN2, OUT_PAD)),                        # W3 (lane-padded)
                const((1, OUT_PAD)),                              # b3 (lane-padded)
            ],
            out_specs=pl.BlockSpec((tm, OUT_PAD), lambda i: (i, 0)),
        ),
        compiler_params=pltpu.CompilerParams(
            dimension_semantics=("parallel",),
            vmem_limit_bytes=32 << 20,
        ),
    )(x_flat, w1, b1, w2, b2, w3, b3)

    return out[:B, :NUM_CLASSES]


def init_params(key):
    """nn.Linear-style init, stored as (in, out) f32 (transposed vs PyTorch)."""
    ks = jax.random.split(key, 6)

    def linear(kw, kb, fan_in, fan_out):
        bound = 1.0 / jnp.sqrt(jnp.float32(fan_in))
        w = jax.random.uniform(kw, (fan_in, fan_out), jnp.float32, -bound, bound)
        b = jax.random.uniform(kb, (1, fan_out), jnp.float32, -bound, bound)
        return w, b

    w1, b1 = linear(ks[0], ks[1], INPUT_SIZE, HIDDEN1)
    w2, b2 = linear(ks[2], ks[3], HIDDEN1, HIDDEN2)
    w3, b3 = linear(ks[4], ks[5], HIDDEN2, NUM_CLASSES)
    return w1, b1, w2, b2, w3, b3


def _reference(x, raw_params, *, mixed=False):
    """Pure-JAX reference mirroring the PyTorch forward.

    mixed=True reproduces the kernel's precision (bf16 x / W1, f32 accumulation)
    for a tight numerical check; mixed=False is the full-f32 module semantics.
    """
    w1, b1, w2, b2, w3, b3 = raw_params
    h = x.reshape(-1, INPUT_SIZE)
    if mixed:
        h = h.astype(jnp.bfloat16)
        w1 = w1.astype(jnp.bfloat16)
    h = jnp.maximum(jnp.dot(h, w1, preferred_element_type=jnp.float32) + b1, 0.0)
    h = jnp.maximum(jnp.dot(h, w2, preferred_element_type=jnp.float32) + b2, 0.0)
    return jnp.dot(h, w3, preferred_element_type=jnp.float32) + b3


if __name__ == "__main__":
    key = jax.random.PRNGKey(0)
    k_x, k_p = jax.random.split(key)

    batch = 2
    x = jax.random.normal(k_x, (batch, 99, 7, 7), jnp.float32)   # NCHW input
    raw_params = init_params(k_p)
    kernel_params = prepare_params(raw_params)

    out = dnn_forward(x, kernel_params)
    out = jax.block_until_ready(out)
    assert out.shape == (batch, NUM_CLASSES)

    # Tight check vs a reference that mirrors the kernel's bf16/f32 precision.
    ref_mixed = _reference(x, raw_params, mixed=True)
    assert jnp.allclose(out, ref_mixed, atol=2e-3, rtol=2e-3), \
        "Pallas output mismatch vs mixed-precision reference"

    # Loose check vs the full-f32 module semantics (bf16 rounding of x/W1 only).
    ref_f32 = _reference(x, raw_params)
    assert jnp.allclose(out, ref_f32, atol=3e-2, rtol=3e-2), \
        "Pallas output mismatch vs f32 reference"

    print("KERNEL_OK")
</pallas_src>

<mosaic_0001>
module attributes {stable_mosaic.version = 11 : i64} {
  func.func @_mlp_kernel(%arg0: i32, %arg1: memref<8x4864xbf16, #tpu.memory_space<vmem>>, %arg2: memref<4864x128xbf16, #tpu.memory_space<vmem>>, %arg3: memref<1x128xf32, #tpu.memory_space<vmem>>, %arg4: memref<128x64xf32, #tpu.memory_space<vmem>>, %arg5: memref<1x64xf32, #tpu.memory_space<vmem>>, %arg6: memref<64x128xf32, #tpu.memory_space<vmem>>, %arg7: memref<1x128xf32, #tpu.memory_space<vmem>>, %arg8: memref<8x128xf32, #tpu.memory_space<vmem>>) attributes {dimension_semantics = [#tpu.dimension_semantics<parallel>], iteration_bounds = array<i64: 1>, scalar_prefetch = 0 : i64, scratch_operands = 0 : i64, tpu.core_type = #tpu.core_type<tc>, window_params = [{transform_indices = @transform_0, window_bounds = array<i64: 8, 4864>}, {pipeline_mode = #tpu.pipeline_mode<synchronous>, transform_indices = @transform_1, window_bounds = array<i64: 4864, 128>}, {pipeline_mode = #tpu.pipeline_mode<synchronous>, transform_indices = @transform_2, window_bounds = array<i64: 1, 128>}, {pipeline_mode = #tpu.pipeline_mode<synchronous>, transform_indices = @transform_3, window_bounds = array<i64: 128, 64>}, {pipeline_mode = #tpu.pipeline_mode<synchronous>, transform_indices = @transform_4, window_bounds = array<i64: 1, 64>}, {pipeline_mode = #tpu.pipeline_mode<synchronous>, transform_indices = @transform_5, window_bounds = array<i64: 64, 128>}, {pipeline_mode = #tpu.pipeline_mode<synchronous>, transform_indices = @transform_6, window_bounds = array<i64: 1, 128>}, {transform_indices = @transform_7, window_bounds = array<i64: 8, 128>}]} {
    %c0 = arith.constant 0 : index
    %c0_0 = arith.constant 0 : index
    %0 = vector.load %arg1[%c0, %c0_0] : memref<8x4864xbf16, #tpu.memory_space<vmem>>, vector<8x4864xbf16>
    %c0_1 = arith.constant 0 : index
    %c0_2 = arith.constant 0 : index
    %1 = vector.load %arg2[%c0_1, %c0_2] : memref<4864x128xbf16, #tpu.memory_space<vmem>>, vector<4864x128xbf16>
    %cst = arith.constant dense<0.000000e+00> : vector<8x128xf32>
    %2 = tpu.matmul %0, %1, %cst {dimension_numbers = #tpu.dot_dimension_numbers<[1], [0], [0], [1], [0, 0, 1, 1], [], []>} : vector<8x4864xbf16>, vector<4864x128xbf16>, vector<8x128xf32> -> vector<8x128xf32>
    %c0_3 = arith.constant 0 : index
    %c0_4 = arith.constant 0 : index
    %3 = vector.load %arg3[%c0_3, %c0_4] : memref<1x128xf32, #tpu.memory_space<vmem>>, vector<1x128xf32>
    %4 = vector.broadcast %3 : vector<1x128xf32> to vector<8x128xf32>
    %5 = arith.addf %2, %4 : vector<8x128xf32>
    %cst_5 = arith.constant 0.000000e+00 : f32
    %6 = vector.broadcast %cst_5 : f32 to vector<8x128xf32>
    %7 = arith.maximumf %5, %6 : vector<8x128xf32>
    %c0_6 = arith.constant 0 : index
    %c0_7 = arith.constant 0 : index
    %8 = vector.load %arg4[%c0_6, %c0_7] : memref<128x64xf32, #tpu.memory_space<vmem>>, vector<128x64xf32>
    %cst_8 = arith.constant dense<0.000000e+00> : vector<8x64xf32>
    %9 = tpu.matmul %7, %8, %cst_8 {dimension_numbers = #tpu.dot_dimension_numbers<[1], [0], [0], [1], [0, 0, 1, 1], [], []>} : vector<8x128xf32>, vector<128x64xf32>, vector<8x64xf32> -> vector<8x64xf32>
    %c0_9 = arith.constant 0 : index
    %c0_10 = arith.constant 0 : index
    %10 = vector.load %arg5[%c0_9, %c0_10] : memref<1x64xf32, #tpu.memory_space<vmem>>, vector<1x64xf32>
    %11 = vector.broadcast %10 : vector<1x64xf32> to vector<8x64xf32>
    %12 = arith.addf %9, %11 : vector<8x64xf32>
    %cst_11 = arith.constant 0.000000e+00 : f32
    %13 = vector.broadcast %cst_11 : f32 to vector<8x64xf32>
    %14 = arith.maximumf %12, %13 : vector<8x64xf32>
    %c0_12 = arith.constant 0 : index
    %c0_13 = arith.constant 0 : index
    %15 = vector.load %arg6[%c0_12, %c0_13] : memref<64x128xf32, #tpu.memory_space<vmem>>, vector<64x128xf32>
    %cst_14 = arith.constant dense<0.000000e+00> : vector<8x128xf32>
    %16 = tpu.matmul %14, %15, %cst_14 {dimension_numbers = #tpu.dot_dimension_numbers<[1], [0], [0], [1], [0, 0, 1, 1], [], []>} : vector<8x64xf32>, vector<64x128xf32>, vector<8x128xf32> -> vector<8x128xf32>
    %c0_15 = arith.constant 0 : index
    %c0_16 = arith.constant 0 : index
    %17 = vector.load %arg7[%c0_15, %c0_16] : memref<1x128xf32, #tpu.memory_space<vmem>>, vector<1x128xf32>
    %18 = vector.broadcast %17 : vector<1x128xf32> to vector<8x128xf32>
    %19 = arith.addf %16, %18 : vector<8x128xf32>
    %c0_17 = arith.constant 0 : index
    %c0_18 = arith.constant 0 : index
    %20 = vector.load %arg8[%c0_17, %c0_18] : memref<8x128xf32, #tpu.memory_space<vmem>>, vector<8x128xf32>
    tpu.vector_store %arg8[%c0_17, %c0_18], %19 {strides = array<i32>} : memref<8x128xf32, #tpu.memory_space<vmem>>, vector<8x128xf32>,
    return
  }
  func.func @transform_0(%arg0: i32) -> (i32, i32) {
    %c0_i32 = arith.constant 0 : i32
    %c0_i32_0 = arith.constant 0 : i32
    return %arg0, %c0_i32 : i32, i32
  }
  func.func @transform_1(%arg0: i32) -> (i32, i32) {
    %c0_i32 = arith.constant 0 : i32
    %c0_i32_0 = arith.constant 0 : i32
    %c0_i32_1 = arith.constant 0 : i32
    return %c0_i32, %c0_i32_0 : i32, i32
  }
  func.func @transform_2(%arg0: i32) -> (i32, i32) {
    %c0_i32 = arith.constant 0 : i32
    %c0_i32_0 = arith.constant 0 : i32
    %c0_i32_1 = arith.constant 0 : i32
    return %c0_i32, %c0_i32_0 : i32, i32
  }
  func.func @transform_3(%arg0: i32) -> (i32, i32) {
    %c0_i32 = arith.constant 0 : i32
    %c0_i32_0 = arith.constant 0 : i32
    %c0_i32_1 = arith.constant 0 : i32
    return %c0_i32, %c0_i32_0 : i32, i32
  }
  func.func @transform_4(%arg0: i32) -> (i32, i32) {
    %c0_i32 = arith.constant 0 : i32
    %c0_i32_0 = arith.constant 0 : i32
    %c0_i32_1 = arith.constant 0 : i32
    return %c0_i32, %c0_i32_0 : i32, i32
  }
  func.func @transform_5(%arg0: i32) -> (i32, i32) {
    %c0_i32 = arith.constant 0 : i32
    %c0_i32_0 = arith.constant 0 : i32
    %c0_i32_1 = arith.constant 0 : i32
    return %c0_i32, %c0_i32_0 : i32, i32
  }
  func.func @transform_6(%arg0: i32) -> (i32, i32) {
    %c0_i32 = arith.constant 0 : i32
    %c0_i32_0 = arith.constant 0 : i32
    %c0_i32_1 = arith.constant 0 : i32
    return %c0_i32, %c0_i32_0 : i32, i32
  }
  func.func @transform_7(%arg0: i32) -> (i32, i32) {
    %c0_i32 = arith.constant 0 : i32
    %c0_i32_0 = arith.constant 0 : i32
    return %arg0, %c0_i32 : i32, i32
  }
}

</mosaic_0001>

<bundles_post_ra>
// kernel: tpu_custom_call.1
= control target key start
LH: loop header
LB: loop body
LE: loop exit
PB: predicated region body
PF: predicated region fallthrough
CT: control target
= control target key end

     0   :  { %12 = vsyncpa [#allocation3], 0  ;;  %s5159_s0 = inlined_call_operand.hbm [shape: bf16[8,4864], index: 0, kind: input, shape index: {}]   ;;  %s5160_s1 = inlined_call_operand.hbm [shape: bf16[4864,128], index: 1, kind: input, shape index: {}]   ;;  %s5161_s2 = inlined_call_operand.hbm [shape: f32[1,128], index: 2, kind: input, shape index: {}]   ;;  %s5162_s3 = inlined_call_operand.vmem [shape: f32[128,64], index: 3, kind: input, shape index: {}]   ;;  %s5163_s4 = inlined_call_operand.hbm [shape: f32[1,64], index: 4, kind: input, shape index: {}]   ;;  %s5164_s5 = inlined_call_operand.hbm [shape: f32[64,128], index: 5, kind: input, shape index: {}]   ;;  %s5165_s6 = inlined_call_operand.hbm [shape: f32[1,128], index: 6, kind: input, shape index: {}]   ;;  %s5166_s7 = inlined_call_operand.hbm [shape: f32[8,128], index: 7, kind: output, shape index: {}]  }
   0x1   :  { %13 = vsyncpa [#allocation6], 0 }
   0x2   :  { %14 = vsyncpa [#allocation9], 0 }
   0x3   :  { %15 = vsyncpa [#allocation12], 0 }
   0x4   :  { %16 = vsyncpa [#allocation4], 0  ;;  %s5005_s24 = smov [#allocation5]  }
   0x5   :  { %s32_s25 = sshll.u32 %s5005_s24, 4  ;;  %s33_s25 = int_to_ptr.vmem [resolvable:$true] %s32_s25 }
   0x6   :  { %s4863_s26 = scalar_lea.vmem %s33_s25, 38912  ;;  %p4868_p1 = scmp.lt.s32.totalorder %s33_s25, %s33_s25 }
   0x7   :  { %p4864_p0 = scmp.ne.s32.totalorder %s33_s25, %s4863_s26  ;;  %p4869_p2 = scmp.lt.s32.totalorder %s4863_s26, %s4863_s26 }
   0x9   :  { %p4870_p3 = por %p4869_p2, %p4868_p1 }
   0xb   :  { %p4871_p4 = pnand %p4870_p3, %p4864_p0 }
   0xd   :  { %4874 = shalt.err (!%p4871_p4)
}
   0xe   :  { %s5006_s27 = smov 64   ;;  %s5007_s28 = smov 4  }
   0xf   :  { %38 = dma.hbm_to_vmem [thread:$0]  %s5160_s1, 38912, %s33_s25, [#allocation6], %s5006_s27, %s5006_s27, %s5007_s28  }
  0x10   :  { %s5008_s8 = smov [#allocation8]   ;;  %s5009_s10 = smov [#allocation2]  }
  0x11   :  { %s57_s9 = sshll.u32 %s5008_s8, 4  ;;  %s23_s11 = sshll.u32 %s5009_s10, 4  ;;  %s58_s9 = int_to_ptr.vmem [resolvable:$true] %s57_s9  ;;  %s24_s11 = int_to_ptr.vmem [resolvable:$true] %s23_s11 }
  0x12   :  { %s4883_s12 = scalar_lea.vmem %s58_s9, 16  ;;  %s4887_s13 = scalar_lea.vmem %s58_s9, 32 }
  0x13   :  { %p4884_p5 = scmp.ne.s32.totalorder %s58_s9, %s4883_s12  ;;  %p4888_p6 = scmp.lt.s32.totalorder %s58_s9, %s58_s9 }
  0x14   :  { %p4889_p7 = scmp.lt.s32.totalorder %s4887_s13, %s4883_s12 }
  0x16   :  { %p4890_p8 = por %p4889_p7, %p4888_p6 }
  0x18   :  { %p4891_p9 = pnand %p4890_p8, %p4884_p5 }
  0x1a   :  { %4894 = shalt.err (!%p4891_p9)
}
  0x1b   :  { %60 = dma.hbm_to_vmem [thread:$0]  %s5163_s4, 16, %s58_s9, [#allocation9]  }
  0x1c   :  { %s4903_s16 = scalar_lea.vmem %s24_s11, 2432  ;;  %p4908_p11 = scmp.lt.s32.totalorder %s24_s11, %s24_s11 }
  0x1d   :  { %p4904_p10 = scmp.ne.s32.totalorder %s24_s11, %s4903_s16  ;;  %p4909_p12 = scmp.lt.s32.totalorder %s4903_s16, %s4903_s16 }
  0x1f   :  { %p4910_p13 = por %p4909_p12, %p4908_p11 }
  0x21   :  { %p4911_p0 = pnand %p4910_p13, %p4904_p10 }
  0x23   :  { %4914 = shalt.err (!%p4911_p0)
}
  0x24   :  { %26 = dma.hbm_to_vmem [thread:$0]  %s5159_s0, 2432, %s24_s11, [#allocation3]  }
  0x25   :  { %s5010_s18 = smov [#allocation7]   ;;  %s5011_s20 = smov [#allocation10]  }
  0x26   :  { %s45_s19 = sshll.u32 %s5010_s18, 4  ;;  %s66_s21 = sshll.u32 %s5011_s20, 4  ;;  %s46_s19 = int_to_ptr.vmem [resolvable:$true] %s45_s19  ;;  %s67_s21 = int_to_ptr.vmem [resolvable:$true] %s66_s21 }
  0x27   :  { %s4923_s22 = scalar_lea.vmem %s46_s19, 16  ;;  %s4927_s4 = scalar_lea.vmem %s46_s19, 32 }
  0x28   :  { %p4924_p1 = scmp.ne.s32.totalorder %s46_s19, %s4923_s22  ;;  %p4928_p2 = scmp.lt.s32.totalorder %s46_s19, %s46_s19 }
  0x29   :  { %p4929_p3 = scmp.lt.s32.totalorder %s4927_s4, %s4923_s22 }
  0x2b   :  { %p4930_p4 = por %p4929_p3, %p4928_p2 }
  0x2d   :  { %p4931_p5 = pnand %p4930_p4, %p4924_p1 }
  0x2f   :  { %4934 = shalt.err (!%p4931_p5)
}
  0x30   :  { %48 = dma.hbm_to_vmem [thread:$0]  %s5161_s2, 16, %s46_s19, [#allocation6]  }
  0x31   :  { %s4943_s25 = scalar_lea.vmem %s67_s21, 1024  ;;  %p4948_p7 = scmp.lt.s32.totalorder %s67_s21, %s67_s21 }
  0x32   :  { %p4944_p6 = scmp.ne.s32.totalorder %s67_s21, %s4943_s25  ;;  %p4949_p8 = scmp.lt.s32.totalorder %s4943_s25, %s4943_s25 }
  0x34   :  { %p4950_p9 = por %p4949_p8, %p4948_p7 }
  0x36   :  { %p4951_p10 = pnand %p4950_p9, %p4944_p6 }
  0x38   :  { %4954 = shalt.err (!%p4951_p10)
}
  0x39   :  { %s5012_s0 = smov 128   ;;  %s5013_s26 = smov 8  }
  0x3a   :  { %72 = dma.hbm_to_vmem [thread:$0]  %s5164_s5, 1024, %s67_s21, [#allocation9], %s5012_s0, %s5012_s0, %s5013_s26  }
  0x3b   :  { %s5014_s29 = smov [#allocation11]  }
  0x3c   :  { %s79_s30 = sshll.u32 %s5014_s29, 4  ;;  %s80_s30 = int_to_ptr.vmem [resolvable:$true] %s79_s30 }
  0x3d   :  { %s4963_s8 = scalar_lea.vmem %s80_s30, 16  ;;  %s4967_s2 = scalar_lea.vmem %s80_s30, 32 }
  0x3e   :  { %p4964_p11 = scmp.ne.s32.totalorder %s80_s30, %s4963_s8  ;;  %p4968_p12 = scmp.lt.s32.totalorder %s80_s30, %s80_s30 }
  0x3f   :  { %p4969_p13 = scmp.lt.s32.totalorder %s4967_s2, %s4963_s8 }
  0x41   :  { %p4970_p0 = por %p4969_p13, %p4968_p12 }
  0x43   :  { %p4971_p1 = pnand %p4970_p0, %p4964_p11 }
  0x45   :  { %4974 = shalt.err (!%p4971_p1)
}
  0x46   :  { %82 = dma.hbm_to_vmem [thread:$0]  %s5165_s6, 16, %s80_s30, [#allocation12]  }
  0x47   :  { %4995 = dma.done.wait [#allocation3], 2432  }
  0x48   :  { %4996 = vsyncadd [#allocation3], 4294964864 }
  0x49   :  { %4997 = dma.done.wait [#allocation6], 38928  }
  0x4a   :  { %4998 = vsyncadd [#allocation6], 4294928368 }
  0x4b   :  { %4999 = dma.done.wait [#allocation9], 1040  }
  0x4c   :  { %5000 = vsyncadd [#allocation9], 4294966256 }
  0x4d   :  { %5001 = dma.done.wait [#allocation12], 16  }
  0x4e   :  { %5002 = vsyncadd [#allocation12], 4294967280  ;;  %v4513_v0 = vld [vmem:[#allocation5 + $0x78] sm:$0xff]   ;;  %v4517_v4 = vld [vmem:[#allocation5 + $0x70] sm:$0xff]   ;;  %vm5016_vm0 = vmmov 0   ;;  %vm3563_vm1 = vcmask 523264  }
  0x4f   :  { %v4514_v1 = vld [vmem:[#allocation5 + $0x38] sm:$0xff]   ;;  %4002 = vmatprep.subr.bf16.mxu0 %v4513_v0  ;;  %v4518_v5 = vld [vmem:[#allocation5 + $0x30] sm:$0xff]   ;;  %v4521_v8 = vld [vmem:[#allocation5 + $0x68] sm:$0xff]  }
  0x50   :  { %v4515_v2 = vld [vmem:[#allocation5 + $0xf8] sm:$0xff]   ;;  %4003 = vmatpush3.bf16.msra.mxu0 %v4514_v1  ;;  %v4519_v6 = vld [vmem:[#allocation5 + $0xf0] sm:$0xff]   ;;  %v4522_v9 = vld [vmem:[#allocation5 + $0x28] sm:$0xff]  }
  0x51   :  { %v4516_v3 = vld [vmem:[#allocation5 + $0xb8] sm:$0xff]   ;;  %4024 = vmatprep.subr.bf16.mxu1 %v4515_v2  ;;  %4004 = vmatprep.subr.bf16.mxu0 %v4517_v4  ;;  %v4520_v7 = vld [vmem:[#allocation5 + $0xb0] sm:$0xff]   ;;  %v4523_v10 = vld [vmem:[#allocation5 + $0xe8] sm:$0xff]  }
  0x52   :  { %4025 = vmatpush3.bf16.msra.mxu1 %v4516_v3  ;;  %v4524_v11 = vld [vmem:[#allocation5 + $0xa8] sm:$0xff]   ;;  %v4525_v12 = vld [vmem:[#allocation5 + $0x60] sm:$0xff]   ;;  %v4529_v16 = vld [vmem:[#allocation5 + $0x58] sm:$0xff]  }
  0x53   :  { %4026 = vmatprep.subr.bf16.mxu1 %v4519_v6  ;;  %v4526_v13 = vld [vmem:[#allocation5 + $0x20] sm:$0xff]   ;;  %v4530_v17 = vld [vmem:[#allocation5 + $0x18] sm:$0xff]   ;;  %v4533_v20 = vld [vmem:[#allocation5 + $0x50] sm:$0xff]  }
  0x54   :  { %4005 = vmatpush3.bf16.msra.mxu0 %v4518_v5  ;;  %v4527_v14 = vld [vmem:[#allocation5 + $0xe0] sm:$0xff]   ;;  %v4531_v18 = vld [vmem:[#allocation5 + $0xd8] sm:$0xff]   ;;  %v4534_v21 = vld [vmem:[#allocation5 + $0x10] sm:$0xff]  }
  0x55   :  { %4006 = vmatprep.subr.bf16.mxu0 %v4521_v8  ;;  %v4528_v15 = vld [vmem:[#allocation5 + $0xa0] sm:$0xff]   ;;  %v4532_v19 = vld [vmem:[#allocation5 + $0x98] sm:$0xff]   ;;  %v4535_v22 = vld [vmem:[#allocation5 + $0xd0] sm:$0xff]  }
  0x56   :  { %4027 = vmatpush3.bf16.msra.mxu1 %v4520_v7  ;;  %v4536_v23 = vld [vmem:[#allocation5 + $0x90] sm:$0xff]   ;;  %v4537_v24 = vld [vmem:[#allocation5 + $0x48] sm:$0xff]   ;;  %v4541_v28 = vld [vmem:[#allocation5 + $0x40] sm:$0xff]  }
  0x57   :  { %4028 = vmatprep.subr.bf16.mxu1 %v4523_v10  ;;  %v4538_v25 = vld [vmem:[#allocation5 + $0x8] sm:$0xff]   ;;  %v4542_v29 = vld [vmem:[#allocation5] sm:$0xff]   ;;  %v4547_v35 = vld [vmem:[#allocation5 + $0x178] sm:$0xff]  }
  0x58   :  { %4007 = vmatpush3.bf16.msra.mxu0 %v4522_v9  ;;  %v4539_v26 = vld [vmem:[#allocation5 + $0xc8] sm:$0xff]   ;;  %v4543_v30 = vld [vmem:[#allocation5 + $0xc0] sm:$0xff]   ;;  %v103_v36 = vld [vmem:[#allocation2 + $0x8] sm:$0xff] }
  0x59   :  { %4008 = vmatprep.subr.bf16.mxu0 %v4525_v12  ;;  %v4540_v27 = vld [vmem:[#allocation5 + $0x88] sm:$0xff]   ;;  %v4546_v34 = vld [vmem:[#allocation5 + $0x80] sm:$0xff]   ;;  %v3659_v37 = vcombine.low %v103_v36, %v103_v36  ;;  %v3660_v38 = vcombine.high %v103_v36, %v103_v36  ;;  %v4550_v39 = vld [vmem:[#allocation5 + $0x138] sm:$0xff]  }
  0x5a   :  { %4029 = vmatpush3.bf16.msra.mxu1 %v4524_v11  ;;  %v102_v31 = vld [vmem:[#allocation2] sm:$0xff]  ;;  %v4551_v40 = vld [vmem:[#allocation5 + $0x1f8] sm:$0xff]   ;;  %v4553_v42 = vld [vmem:[#allocation5 + $0x170] sm:$0xff]  }
  0x5b   :  { %4030 = vmatprep.subr.bf16.mxu1 %v4527_v14  ;;  %v3657_v32 = vcombine.low %v102_v31, %v102_v31  ;;  %v3658_v33 = vcombine.high %v102_v31, %v102_v31  ;;  %2765 = vmatprep.mubr.bf16.mxu1 %v3660_v38  ;;  %v4552_v41 = vld [vmem:[#allocation5 + $0x1b8] sm:$0xff]   ;;  %v4554_v43 = vld [vmem:[#allocation5 + $0x130] sm:$0xff]   ;;  %v4557_v46 = vld [vmem:[#allocation5 + $0x168] sm:$0xff]  }
  0x5c   :  { %4009 = vmatpush3.bf16.msra.mxu0 %v4526_v13  ;;  %v4555_v44 = vld [vmem:[#allocation5 + $0x1f0] sm:$0xff]   ;;  %v4558_v47 = vld [vmem:[#allocation5 + $0x128] sm:$0xff]   ;;  %v4561_v50 = vld [vmem:[#allocation5 + $0x160] sm:$0xff]  }
  0x5d   :  { %4010 = vmatprep.subr.bf16.mxu0 %v4529_v16  ;;  %2725 = vmatprep.mubr.bf16.mxu0 %v3658_v33  ;;  %v4556_v45 = vld [vmem:[#allocation5 + $0x1b0] sm:$0xff]   ;;  %v4559_v48 = vld [vmem:[#allocation5 + $0x1e8] sm:$0xff]   ;;  %v4562_v51 = vld [vmem:[#allocation5 + $0x120] sm:$0xff]  }
  0x5e   :  { %4031 = vmatpush3.bf16.msra.mxu1 %v4528_v15  ;;  %v4560_v49 = vld [vmem:[#allocation5 + $0x1a8] sm:$0xff]   ;;  %v4563_v52 = vld [vmem:[#allocation5 + $0x1e0] sm:$0xff]   ;;  %v4565_v54 = vld [vmem:[#allocation5 + $0x158] sm:$0xff]  }
  0x5f   :  { %4032 = vmatprep.subr.bf16.mxu1 %v4531_v18  ;;  %v4564_v53 = vld [vmem:[#allocation5 + $0x1a0] sm:$0xff]   ;;  %v4566_v55 = vld [vmem:[#allocation5 + $0x118] sm:$0xff]   ;;  %v4569_v58 = vld [vmem:[#allocation5 + $0x150] sm:$0xff]  }
  0x60   :  { %4011 = vmatpush3.bf16.msra.mxu0 %v4530_v17  ;;  %v4567_v56 = vld [vmem:[#allocation5 + $0x1d8] sm:$0xff]   ;;  %v4570_v59 = vld [vmem:[#allocation5 + $0x110] sm:$0xff]   ;;  %v4573_v62 = vld [vmem:[#allocation5 + $0x148] sm:$0xff]  }
  0x61   :  { %4012 = vmatprep.subr.bf16.mxu0 %v4533_v20  ;;  %v4568_v57 = vld [vmem:[#allocation5 + $0x198] sm:$0xff]   ;;  %v4571_v60 = vld [vmem:[#allocation5 + $0x1d0] sm:$0xff]   ;;  %v4574_v63 = vld [vmem:[#allocation5 + $0x108] sm:$0xff]  }
  0x62   :  { %4033 = vmatpush3.bf16.msra.mxu1 %v4532_v19  ;;  %v4572_v61 = vld [vmem:[#allocation5 + $0x190] sm:$0xff]   ;;  %v4575_v0 = vld [vmem:[#allocation5 + $0x1c8] sm:$0xff]   ;;  %v4577_v2 = vld [vmem:[#allocation5 + $0x140] sm:$0xff]  }
  0x63   :  { %4034 = vmatprep.subr.bf16.mxu1 %v4535_v22  ;;  %v4576_v1 = vld [vmem:[#allocation5 + $0x188] sm:$0xff]   ;;  %v4578_v3 = vld [vmem:[#allocation5 + $0x100] sm:$0xff]   ;;  %v104_v5 = vld [vmem:[#allocation2 + $0x10] sm:$0xff] }
  0x64   :  { %4013 = vmatpush3.bf16.msra.mxu0 %v4534_v21  ;;  %v4579_v4 = vld [vmem:[#allocation5 + $0x1c0] sm:$0xff]   ;;  %v3661_v6 = vcombine.low %v104_v5, %v104_v5  ;;  %v3662_v7 = vcombine.high %v104_v5, %v104_v5  ;;  %v4583_v9 = vld [vmem:[#allocation5 + $0x278] sm:$0xff]   ;;  %v4589_v16 = vld [vmem:[#allocation5 + $0x270] sm:$0xff]  }
  0x65   :  { %4014 = vmatprep.subr.bf16.mxu0 %v4537_v24  ;;  %v4582_v8 = vld [vmem:[#allocation5 + $0x180] sm:$0xff]   ;;  %v4586_v13 = vld [vmem:[#allocation5 + $0x238] sm:$0xff]   ;;  %v4590_v17 = vld [vmem:[#allocation5 + $0x230] sm:$0xff]  }
  0x66   :  { %4035 = vmatpush3.bf16.msra.mxu1 %v4536_v23  ;;  %v105_v10 = vld [vmem:[#allocation2 + $0x18] sm:$0xff]  ;;  %v4587_v14 = vld [vmem:[#allocation5 + $0x2f8] sm:$0xff]   ;;  %v4591_v18 = vld [vmem:[#allocation5 + $0x2f0] sm:$0xff]  }
  0x67   :  { %4036 = vmatprep.subr.bf16.mxu1 %v4539_v26  ;;  %v3663_v11 = vcombine.low %v105_v10, %v105_v10  ;;  %v3664_v12 = vcombine.high %v105_v10, %v105_v10  ;;  %v4588_v15 = vld [vmem:[#allocation5 + $0x2b8] sm:$0xff]   ;;  %v4592_v19 = vld [vmem:[#allocation5 + $0x2b0] sm:$0xff]   ;;  %v4593_v20 = vld [vmem:[#allocation5 + $0x268] sm:$0xff]  }
  0x68   :  { %4015 = vmatpush3.bf16.msra.mxu0 %v4538_v25  ;;  %v4594_v21 = vld [vmem:[#allocation5 + $0x228] sm:$0xff]   ;;  %v4597_v24 = vld [vmem:[#allocation5 + $0x260] sm:$0xff]   ;;  %v4604_v31 = vld [vmem:[#allocation5 + $0x298] sm:$0xff]  }
  0x69   :  { %4016 = vmatprep.subr.bf16.mxu0 %v4541_v28  ;;  %v4595_v22 = vld [vmem:[#allocation5 + $0x2e8] sm:$0xff]   ;;  %v4598_v25 = vld [vmem:[#allocation5 + $0x220] sm:$0xff]   ;;  %v4601_v28 = vld [vmem:[#allocation5 + $0x258] sm:$0xff]  }
  0x6a   :  { %4037 = vmatpush3.bf16.msra.mxu1 %v4540_v27  ;;  %v4596_v23 = vld [vmem:[#allocation5 + $0x2a8] sm:$0xff]   ;;  %v4599_v26 = vld [vmem:[#allocation5 + $0x2e0] sm:$0xff]   ;;  %v4606_v33 = vld [vmem:[#allocation5 + $0x210] sm:$0xff]  }
  0x6b   :  { %4038 = vmatprep.subr.bf16.mxu1 %v4543_v30  ;;  %v4600_v27 = vld [vmem:[#allocation5 + $0x2a0] sm:$0xff]   ;;  %v4603_v30 = vld [vmem:[#allocation5 + $0x2d8] sm:$0xff]   ;;  %v4609_v36 = vld [vmem:[#allocation5 + $0x248] sm:$0xff]  }
  0x6c   :  { %4017 = vmatpush3.bf16.msra.mxu0 %v4542_v29  ;;  %v4602_v29 = vld [vmem:[#allocation5 + $0x218] sm:$0xff]   ;;  %v4611_v38 = vld [vmem:[#allocation5 + $0x2c8] sm:$0xff]  }
  0x6d   :  { %4046 = vmatprep.subr.bf16.mxu0 %v4547_v35  ;;  %v4608_v35 = vld [vmem:[#allocation5 + $0x290] sm:$0xff]   ;;  %v4640_v5 = vld [vmem:[#allocation5 + $0x398] sm:$0xff]   ;;  %v4645_v10 = vld [vmem:[#allocation5 + $0x348] sm:$0xff]  }
  0x6e   :  { %4039 = vmatpush3.bf16.msra.mxu1 %v4546_v34  ;;  %v4607_v34 = vld [vmem:[#allocation5 + $0x2d0] sm:$0xff]  }
  0x6f   :  { %2726 = vmatmul.mubr.bf16.vlgmr.msra.gmra.mxu0 %v3657_v32  ;;  %4068 = vmatprep.subr.bf16.mxu1 %v4551_v40  ;;  %v4605_v32 = vld [vmem:[#allocation5 + $0x250] sm:$0xff]   ;;  %v4613_v40 = vld [vmem:[#allocation5 + $0x240] sm:$0xff]  }
  0x70   :  { %4047 = vmatpush3.bf16.msra.mxu0 %v4550_v39  ;;  %2805 = vmatprep.mubr.bf16.mxu0 %v3662_v7  ;;  %v4612_v39 = vld [vmem:[#allocation5 + $0x288] sm:$0xff]   ;;  %v4642_v7 = vld [vmem:[#allocation5 + $0x310] sm:$0xff]  }
  0x71   :  { %2766 = vmatmul.mubr.bf16.vlgmr.msra.gmra.mxu1 %v3659_v37  ;;  %4048 = vmatprep.subr.bf16.mxu0 %v4553_v42  ;;  %v4610_v37 = vld [vmem:[#allocation5 + $0x208] sm:$0xff]   ;;  %v4615_v42 = vld [vmem:[#allocation5 + $0x2c0] sm:$0xff]  }
  0x72   :  { %4069 = vmatpush3.bf16.msra.mxu1 %v4552_v41  ;;  %2845 = vmatprep.mubr.bf16.mxu1 %v3664_v12  ;;  %v4614_v41 = vld [vmem:[#allocation5 + $0x200] sm:$0xff]   ;;  %v4647_v12 = vld [vmem:[#allocation5 + $0x3c8] sm:$0xff]  }
  0x73   :  { %4070 = vmatprep.subr.bf16.mxu1 %v4555_v44 }
  0x74   :  { %4049 = vmatpush3.bf16.msra.mxu0 %v4554_v43  ;;  %v106_v43 = vld [vmem:[#allocation2 + $0x20] sm:$0xff] }
  0x75   :  { %4050 = vmatprep.subr.bf16.mxu0 %v4557_v46  ;;  %v3665_v44 = vcombine.low %v106_v43, %v106_v43  ;;  %v4618_v46 = vld [vmem:[#allocation5 + $0x280] sm:$0xff]  }
  0x76   :  { %4071 = vmatpush3.bf16.msra.mxu1 %v4556_v45  ;;  %v3666_v45 = vcombine.high %v106_v43, %v106_v43  ;;  %v4676_v43 = vld [vmem:[#allocation5 + $0x498] sm:$0xff]  }
  0x77   :  { %4072 = vmatprep.subr.bf16.mxu1 %v4559_v48  ;;  %v107_v48 = vld [vmem:[#allocation2 + $0x28] sm:$0xff] }
  0x78   :  { %4051 = vmatpush3.bf16.msra.mxu0 %v4558_v47  ;;  %v4619_v47 = vld [vmem:[#allocation5 + $0x378] sm:$0xff]  }
  0x79   :  { %4052 = vmatprep.subr.bf16.mxu0 %v4561_v50  ;;  %v3668_v50 = vcombine.high %v107_v48, %v107_v48 }
  0x7a   :  { %4073 = vmatpush3.bf16.msra.mxu1 %v4560_v49  ;;  %v3667_v49 = vcombine.low %v107_v48, %v107_v48  ;;  %v4681_v48 = vld [vmem:[#allocation5 + $0x448] sm:$0xff]  }
  0x7b   :  { %4074 = vmatprep.subr.bf16.mxu1 %v4563_v52  ;;  %v4623_v52 = vld [vmem:[#allocation5 + $0x3f8] sm:$0xff]  }
  0x7c   :  { %4053 = vmatpush3.bf16.msra.mxu0 %v4562_v51  ;;  %v4622_v51 = vld [vmem:[#allocation5 + $0x338] sm:$0xff]  }
  0x7d   :  { %4054 = vmatprep.subr.bf16.mxu0 %v4565_v54  ;;  %v4625_v54 = vld [vmem:[#allocation5 + $0x370] sm:$0xff]  }
  0x7e   :  { %4075 = vmatpush3.bf16.msra.mxu1 %v4564_v53  ;;  %v4624_v53 = vld [vmem:[#allocation5 + $0x3b8] sm:$0xff]  }
  0x7f   :  { %4076 = vmatprep.subr.bf16.mxu1 %v4567_v56  ;;  %v4627_v56 = vld [vmem:[#allocation5 + $0x3f0] sm:$0xff]  }
  0x80   :  { %4055 = vmatpush3.bf16.msra.mxu0 %v4566_v55  ;;  %v4626_v55 = vld [vmem:[#allocation5 + $0x330] sm:$0xff]  }
  0x81   :  { %4056 = vmatprep.subr.bf16.mxu0 %v4569_v58  ;;  %v4629_v58 = vld [vmem:[#allocation5 + $0x368] sm:$0xff]  }
  0x82   :  { %4077 = vmatpush3.bf16.msra.mxu1 %v4568_v57  ;;  %v4628_v57 = vld [vmem:[#allocation5 + $0x3b0] sm:$0xff]  }
  0x83   :  { %4078 = vmatprep.subr.bf16.mxu1 %v4571_v60  ;;  %v4631_v60 = vld [vmem:[#allocation5 + $0x3e8] sm:$0xff]  }
  0x84   :  { %4057 = vmatpush3.bf16.msra.mxu0 %v4570_v59  ;;  %v4630_v59 = vld [vmem:[#allocation5 + $0x328] sm:$0xff]  }
  0x85   :  { %4058 = vmatprep.subr.bf16.mxu0 %v4573_v62  ;;  %v4633_v62 = vld [vmem:[#allocation5 + $0x360] sm:$0xff]  }
  0x86   :  { %4079 = vmatpush3.bf16.msra.mxu1 %v4572_v61  ;;  %v4632_v61 = vld [vmem:[#allocation5 + $0x3a8] sm:$0xff]  }
  0x87   :  { %4080 = vmatprep.subr.bf16.mxu1 %v4575_v0  ;;  %v4635_v0 = vld [vmem:[#allocation5 + $0x3e0] sm:$0xff]  }
  0x88   :  { %4059 = vmatpush3.bf16.msra.mxu0 %v4574_v63  ;;  %v4634_v63 = vld [vmem:[#allocation5 + $0x320] sm:$0xff]  }
  0x89   :  { %4060 = vmatprep.subr.bf16.mxu0 %v4577_v2  ;;  %v4637_v2 = vld [vmem:[#allocation5 + $0x358] sm:$0xff]  }
  0x8a   :  { %4081 = vmatpush3.bf16.msra.mxu1 %v4576_v1  ;;  %v4636_v1 = vld [vmem:[#allocation5 + $0x3a0] sm:$0xff]  }
  0x8b   :  { %4082 = vmatprep.subr.bf16.mxu1 %v4579_v4  ;;  %v4639_v4 = vld [vmem:[#allocation5 + $0x3d8] sm:$0xff]  }
  0x8c   :  { %4061 = vmatpush3.bf16.msra.mxu0 %v4578_v3  ;;  %v4638_v3 = vld [vmem:[#allocation5 + $0x318] sm:$0xff]  }
  0x8d   :  { %4090 = vmatprep.subr.bf16.mxu0 %v4583_v9  ;;  %v4644_v9 = vld [vmem:[#allocation5 + $0x390] sm:$0xff]  }
  0x8e   :  { %4083 = vmatpush3.bf16.msra.mxu1 %v4582_v8  ;;  %v4643_v8 = vld [vmem:[#allocation5 + $0x3d0] sm:$0xff]  }
  0x8f   :  { %2806 = vmatmul.mubr.bf16.vlgmr.msra.gmra.mxu0 %v3661_v6  ;;  %4112 = vmatprep.subr.bf16.mxu1 %v4587_v14  ;;  %v4641_v6 = vld [vmem:[#allocation5 + $0x350] sm:$0xff]   ;;  %v4649_v14 = vld [vmem:[#allocation5 + $0x340] sm:$0xff]  }
  0x90   :  { %4091 = vmatpush3.bf16.msra.mxu0 %v4586_v13  ;;  %2885 = vmatprep.mubr.bf16.mxu0 %v3666_v45  ;;  %v4648_v13 = vld [vmem:[#allocation5 + $0x388] sm:$0xff]   ;;  %v4678_v45 = vld [vmem:[#allocation5 + $0x410] sm:$0xff]  }
  0x91   :  { %2846 = vmatmul.mubr.bf16.vlgmr.msra.gmra.mxu1 %v3663_v11  ;;  %4092 = vmatprep.subr.bf16.mxu0 %v4589_v16  ;;  %v4646_v11 = vld [vmem:[#allocation5 + $0x308] sm:$0xff]   ;;  %v4651_v16 = vld [vmem:[#allocation5 + $0x3c0] sm:$0xff]  }
  0x92   :  { %4113 = vmatpush3.bf16.msra.mxu1 %v4588_v15  ;;  %2925 = vmatprep.mubr.bf16.mxu1 %v3668_v50  ;;  %v4650_v15 = vld [vmem:[#allocation5 + $0x300] sm:$0xff]   ;;  %v4683_v50 = vld [vmem:[#allocation5 + $0x4c8] sm:$0xff]  }
  0x93   :  { %4114 = vmatprep.subr.bf16.mxu1 %v4591_v18 }
  0x94   :  { %4093 = vmatpush3.bf16.msra.mxu0 %v4590_v17  ;;  %v108_v17 = vld [vmem:[#allocation2 + $0x30] sm:$0xff] }
  0x95   :  { %4094 = vmatprep.subr.bf16.mxu0 %v4593_v20  ;;  %v3669_v18 = vcombine.low %v108_v17, %v108_v17  ;;  %v4654_v20 = vld [vmem:[#allocation5 + $0x380] sm:$0xff]  }
  0x96   :  { %4115 = vmatpush3.bf16.msra.mxu1 %v4592_v19  ;;  %v3670_v19 = vcombine.high %v108_v17, %v108_v17  ;;  %v4712_v17 = vld [vmem:[#allocation5 + $0x598] sm:$0xff]  }
  0x97   :  { %4116 = vmatprep.subr.bf16.mxu1 %v4595_v22  ;;  %v109_v22 = vld [vmem:[#allocation2 + $0x38] sm:$0xff] }
  0x98   :  { %4095 = vmatpush3.bf16.msra.mxu0 %v4594_v21  ;;  %v4655_v21 = vld [vmem:[#allocation5 + $0x478] sm:$0xff]  }
  0x99   :  { %4096 = vmatprep.subr.bf16.mxu0 %v4597_v24  ;;  %v3672_v24 = vcombine.high %v109_v22, %v109_v22 }
  0x9a   :  { %4117 = vmatpush3.bf16.msra.mxu1 %v4596_v23  ;;  %v3671_v23 = vcombine.low %v109_v22, %v109_v22  ;;  %v4717_v22 = vld [vmem:[#allocation5 + $0x548] sm:$0xff]  }
  0x9b   :  { %4118 = vmatprep.subr.bf16.mxu1 %v4599_v26  ;;  %v4659_v26 = vld [vmem:[#allocation5 + $0x4f8] sm:$0xff]  }
  0x9c   :  { %4097 = vmatpush3.bf16.msra.mxu0 %v4598_v25  ;;  %v4658_v25 = vld [vmem:[#allocation5 + $0x438] sm:$0xff]  }
  0x9d   :  { %4098 = vmatprep.subr.bf16.mxu0 %v4601_v28  ;;  %v4661_v28 = vld [vmem:[#allocation5 + $0x470] sm:$0xff]  }
  0x9e   :  { %4119 = vmatpush3.bf16.msra.mxu1 %v4600_v27  ;;  %v4660_v27 = vld [vmem:[#allocation5 + $0x4b8] sm:$0xff]  }
  0x9f   :  { %4120 = vmatprep.subr.bf16.mxu1 %v4603_v30  ;;  %v4663_v30 = vld [vmem:[#allocation5 + $0x4f0] sm:$0xff]  }
  0xa0   :  { %4099 = vmatpush3.bf16.msra.mxu0 %v4602_v29  ;;  %v4662_v29 = vld [vmem:[#allocation5 + $0x430] sm:$0xff]  }
  0xa1   :  { %4100 = vmatprep.subr.bf16.mxu0 %v4605_v32  ;;  %v4665_v32 = vld [vmem:[#allocation5 + $0x468] sm:$0xff]  }
  0xa2   :  { %4121 = vmatpush3.bf16.msra.mxu1 %v4604_v31  ;;  %v4664_v31 = vld [vmem:[#allocation5 + $0x4b0] sm:$0xff]  }
  0xa3   :  { %4122 = vmatprep.subr.bf16.mxu1 %v4607_v34  ;;  %v4667_v34 = vld [vmem:[#allocation5 + $0x4e8] sm:$0xff]  }
  0xa4   :  { %4101 = vmatpush3.bf16.msra.mxu0 %v4606_v33  ;;  %v4666_v33 = vld [vmem:[#allocation5 + $0x428] sm:$0xff]  }
  0xa5   :  { %4102 = vmatprep.subr.bf16.mxu0 %v4609_v36  ;;  %v4669_v36 = vld [vmem:[#allocation5 + $0x460] sm:$0xff]  }
  0xa6   :  { %4123 = vmatpush3.bf16.msra.mxu1 %v4608_v35  ;;  %v4668_v35 = vld [vmem:[#allocation5 + $0x4a8] sm:$0xff]  }
  0xa7   :  { %4124 = vmatprep.subr.bf16.mxu1 %v4611_v38  ;;  %v4671_v38 = vld [vmem:[#allocation5 + $0x4e0] sm:$0xff]  }
  0xa8   :  { %4103 = vmatpush3.bf16.msra.mxu0 %v4610_v37  ;;  %v4670_v37 = vld [vmem:[#allocation5 + $0x420] sm:$0xff]  }
  0xa9   :  { %4104 = vmatprep.subr.bf16.mxu0 %v4613_v40  ;;  %v4673_v40 = vld [vmem:[#allocation5 + $0x458] sm:$0xff]  }
  0xaa   :  { %4125 = vmatpush3.bf16.msra.mxu1 %v4612_v39  ;;  %v4672_v39 = vld [vmem:[#allocation5 + $0x4a0] sm:$0xff]  }
  0xab   :  { %4126 = vmatprep.subr.bf16.mxu1 %v4615_v42  ;;  %v4675_v42 = vld [vmem:[#allocation5 + $0x4d8] sm:$0xff]  }
  0xac   :  { %4105 = vmatpush3.bf16.msra.mxu0 %v4614_v41  ;;  %v4674_v41 = vld [vmem:[#allocation5 + $0x418] sm:$0xff]  }
  0xad   :  { %4134 = vmatprep.subr.bf16.mxu0 %v4619_v47  ;;  %v4680_v47 = vld [vmem:[#allocation5 + $0x490] sm:$0xff]  }
  0xae   :  { %4127 = vmatpush3.bf16.msra.mxu1 %v4618_v46  ;;  %v4679_v46 = vld [vmem:[#allocation5 + $0x4d0] sm:$0xff]  }
  0xaf   :  { %2886 = vmatmul.mubr.bf16.vlgmr.msra.gmra.mxu0 %v3665_v44  ;;  %4156 = vmatprep.subr.bf16.mxu1 %v4623_v52  ;;  %v4677_v44 = vld [vmem:[#allocation5 + $0x450] sm:$0xff]   ;;  %v4685_v52 = vld [vmem:[#allocation5 + $0x440] sm:$0xff]  }
  0xb0   :  { %4135 = vmatpush3.bf16.msra.mxu0 %v4622_v51  ;;  %2965 = vmatprep.mubr.bf16.mxu0 %v3670_v19  ;;  %v4684_v51 = vld [vmem:[#allocation5 + $0x488] sm:$0xff]   ;;  %v4714_v19 = vld [vmem:[#allocation5 + $0x510] sm:$0xff]  }
  0xb1   :  { %2926 = vmatmul.mubr.bf16.vlgmr.msra.gmra.mxu1 %v3667_v49  ;;  %4136 = vmatprep.subr.bf16.mxu0 %v4625_v54  ;;  %v4682_v49 = vld [vmem:[#allocation5 + $0x408] sm:$0xff]   ;;  %v4687_v54 = vld [vmem:[#allocation5 + $0x4c0] sm:$0xff]  }
  0xb2   :  { %4157 = vmatpush3.bf16.msra.mxu1 %v4624_v53  ;;  %3005 = vmatprep.mubr.bf16.mxu1 %v3672_v24  ;;  %v4686_v53 = vld [vmem:[#allocation5 + $0x400] sm:$0xff]   ;;  %v4719_v24 = vld [vmem:[#allocation5 + $0x5c8] sm:$0xff]  }
  0xb3   :  { %4158 = vmatprep.subr.bf16.mxu1 %v4627_v56 }
  0xb4   :  { %4137 = vmatpush3.bf16.msra.mxu0 %v4626_v55  ;;  %v110_v55 = vld [vmem:[#allocation2 + $0x40] sm:$0xff] }
  0xb5   :  { %4138 = vmatprep.subr.bf16.mxu0 %v4629_v58  ;;  %v3673_v56 = vcombine.low %v110_v55, %v110_v55  ;;  %v4690_v58 = vld [vmem:[#allocation5 + $0x480] sm:$0xff]  }
  0xb6   :  { %4159 = vmatpush3.bf16.msra.mxu1 %v4628_v57  ;;  %v3674_v57 = vcombine.high %v110_v55, %v110_v55  ;;  %v4748_v55 = vld [vmem:[#allocation5 + $0x698] sm:$0xff]  }
  0xb7   :  { %4160 = vmatprep.subr.bf16.mxu1 %v4631_v60  ;;  %v111_v60 = vld [vmem:[#allocation2 + $0x48] sm:$0xff] }
  0xb8   :  { %4139 = vmatpush3.bf16.msra.mxu0 %v4630_v59  ;;  %v4691_v59 = vld [vmem:[#allocation5 + $0x578] sm:$0xff]  }
  0xb9   :  { %4140 = vmatprep.subr.bf16.mxu0 %v4633_v62  ;;  %v3676_v62 = vcombine.high %v111_v60, %v111_v60 }
  0xba   :  { %4161 = vmatpush3.bf16.msra.mxu1 %v4632_v61  ;;  %v3675_v61 = vcombine.low %v111_v60, %v111_v60  ;;  %v4753_v60 = vld [vmem:[#allocation5 + $0x648] sm:$0xff]  }
  0xbb   :  { %4162 = vmatprep.subr.bf16.mxu1 %v4635_v0  ;;  %v4695_v0 = vld [vmem:[#allocation5 + $0x5f8] sm:$0xff]  }
  0xbc   :  { %4141 = vmatpush3.bf16.msra.mxu0 %v4634_v63  ;;  %v4694_v63 = vld [vmem:[#allocation5 + $0x538] sm:$0xff]  }
  0xbd   :  { %4142 = vmatprep.subr.bf16.mxu0 %v4637_v2  ;;  %v4697_v2 = vld [vmem:[#allocation5 + $0x570] sm:$0xff]  }
  0xbe   :  { %4163 = vmatpush3.bf16.msra.mxu1 %v4636_v1  ;;  %v4696_v1 = vld [vmem:[#allocation5 + $0x5b8] sm:$0xff]  }
  0xbf   :  { %4164 = vmatprep.subr.bf16.mxu1 %v4639_v4  ;;  %v4699_v4 = vld [vmem:[#allocation5 + $0x5f0] sm:$0xff]  }
  0xc0   :  { %4143 = vmatpush3.bf16.msra.mxu0 %v4638_v3  ;;  %v4698_v3 = vld [vmem:[#allocation5 + $0x530] sm:$0xff]  }
  0xc1   :  { %4144 = vmatprep.subr.bf16.mxu0 %v4641_v6  ;;  %v4701_v6 = vld [vmem:[#allocation5 + $0x568] sm:$0xff]  }
  0xc2   :  { %4165 = vmatpush3.bf16.msra.mxu1 %v4640_v5  ;;  %v4700_v5 = vld [vmem:[#allocation5 + $0x5b0] sm:$0xff]  }
  0xc3   :  { %4166 = vmatprep.subr.bf16.mxu1 %v4643_v8  ;;  %v4703_v8 = vld [vmem:[#allocation5 + $0x5e8] sm:$0xff]  }
  0xc4   :  { %4145 = vmatpush3.bf16.msra.mxu0 %v4642_v7  ;;  %v4702_v7 = vld [vmem:[#allocation5 + $0x528] sm:$0xff]  }
  0xc5   :  { %4146 = vmatprep.subr.bf16.mxu0 %v4645_v10  ;;  %v4705_v10 = vld [vmem:[#allocation5 + $0x560] sm:$0xff]  }
  0xc6   :  { %4167 = vmatpush3.bf16.msra.mxu1 %v4644_v9  ;;  %v4704_v9 = vld [vmem:[#allocation5 + $0x5a8] sm:$0xff]  }
  0xc7   :  { %4168 = vmatprep.subr.bf16.mxu1 %v4647_v12  ;;  %v4707_v12 = vld [vmem:[#allocation5 + $0x5e0] sm:$0xff]  }
  0xc8   :  { %4147 = vmatpush3.bf16.msra.mxu0 %v4646_v11  ;;  %v4706_v11 = vld [vmem:[#allocation5 + $0x520] sm:$0xff]  }
  0xc9   :  { %4148 = vmatprep.subr.bf16.mxu0 %v4649_v14  ;;  %v4709_v14 = vld [vmem:[#allocation5 + $0x558] sm:$0xff]  }
  0xca   :  { %4169 = vmatpush3.bf16.msra.mxu1 %v4648_v13  ;;  %v4708_v13 = vld [vmem:[#allocation5 + $0x5a0] sm:$0xff]  }
  0xcb   :  { %4170 = vmatprep.subr.bf16.mxu1 %v4651_v16  ;;  %v4711_v16 = vld [vmem:[#allocation5 + $0x5d8] sm:$0xff]  }
  0xcc   :  { %4149 = vmatpush3.bf16.msra.mxu0 %v4650_v15  ;;  %v4710_v15 = vld [vmem:[#allocation5 + $0x518] sm:$0xff]  }
  0xcd   :  { %4178 = vmatprep.subr.bf16.mxu0 %v4655_v21  ;;  %v4716_v21 = vld [vmem:[#allocation5 + $0x590] sm:$0xff]  }
  0xce   :  { %4171 = vmatpush3.bf16.msra.mxu1 %v4654_v20  ;;  %v4715_v20 = vld [vmem:[#allocation5 + $0x5d0] sm:$0xff]  }
  0xcf   :  { %2966 = vmatmul.mubr.bf16.vlgmr.msra.gmra.mxu0 %v3669_v18  ;;  %4200 = vmatprep.subr.bf16.mxu1 %v4659_v26  ;;  %v4713_v18 = vld [vmem:[#allocation5 + $0x550] sm:$0xff]   ;;  %v4721_v26 = vld [vmem:[#allocation5 + $0x540] sm:$0xff]  }
  0xd0   :  { %4179 = vmatpush3.bf16.msra.mxu0 %v4658_v25  ;;  %3045 = vmatprep.mubr.bf16.mxu0 %v3674_v57  ;;  %v4720_v25 = vld [vmem:[#allocation5 + $0x588] sm:$0xff]   ;;  %v4750_v57 = vld [vmem:[#allocation5 + $0x610] sm:$0xff]  }
  0xd1   :  { %3006 = vmatmul.mubr.bf16.vlgmr.msra.gmra.mxu1 %v3671_v23  ;;  %4180 = vmatprep.subr.bf16.mxu0 %v4661_v28  ;;  %v4718_v23 = vld [vmem:[#allocation5 + $0x508] sm:$0xff]   ;;  %v4723_v28 = vld [vmem:[#allocation5 + $0x5c0] sm:$0xff]  }
  0xd2   :  { %4201 = vmatpush3.bf16.msra.mxu1 %v4660_v27  ;;  %3085 = vmatprep.mubr.bf16.mxu1 %v3676_v62  ;;  %v4722_v27 = vld [vmem:[#allocation5 + $0x500] sm:$0xff]   ;;  %v4755_v62 = vld [vmem:[#allocation5 + $0x6c8] sm:$0xff]  }
  0xd3   :  { %4202 = vmatprep.subr.bf16.mxu1 %v4663_v30 }
  0xd4   :  { %4181 = vmatpush3.bf16.msra.mxu0 %v4662_v29  ;;  %v112_v29 = vld [vmem:[#allocation2 + $0x50] sm:$0xff] }
  0xd5   :  { %4182 = vmatprep.subr.bf16.mxu0 %v4665_v32  ;;  %v3677_v30 = vcombine.low %v112_v29, %v112_v29  ;;  %v4726_v32 = vld [vmem:[#allocation5 + $0x580] sm:$0xff]  }
  0xd6   :  { %4203 = vmatpush3.bf16.msra.mxu1 %v4664_v31  ;;  %v3678_v31 = vcombine.high %v112_v29, %v112_v29 }
  0xd7   :  { %4204 = vmatprep.subr.bf16.mxu1 %v4667_v34  ;;  %v113_v34 = vld [vmem:[#allocation2 + $0x58] sm:$0xff] }
  0xd8   :  { %4183 = vmatpush3.bf16.msra.mxu0 %v4666_v33  ;;  %v4727_v33 = vld [vmem:[#allocation5 + $0x678] sm:$0xff]  }
  0xd9   :  { %4184 = vmatprep.subr.bf16.mxu0 %v4669_v36  ;;  %v3680_v36 = vcombine.high %v113_v34, %v113_v34 }
  0xda   :  { %4205 = vmatpush3.bf16.msra.mxu1 %v4668_v35  ;;  %v3679_v35 = vcombine.low %v113_v34, %v113_v34  ;;  %v4776_v34 = vld [vmem:[#allocation5 + $0x7a8] sm:$0xff]  }
  0xdb   :  { %4206 = vmatprep.subr.bf16.mxu1 %v4671_v38  ;;  %v4731_v38 = vld [vmem:[#allocation5 + $0x6f8] sm:$0xff]  }
  0xdc   :  { %4185 = vmatpush3.bf16.msra.mxu0 %v4670_v37  ;;  %v4730_v37 = vld [vmem:[#allocation5 + $0x638] sm:$0xff]  }
  0xdd   :  { %4186 = vmatprep.subr.bf16.mxu0 %v4673_v40  ;;  %v4733_v40 = vld [vmem:[#allocation5 + $0x670] sm:$0xff]  }
  0xde   :  { %4207 = vmatpush3.bf16.msra.mxu1 %v4672_v39  ;;  %v4732_v39 = vld [vmem:[#allocation5 + $0x6b8] sm:$0xff]  }
  0xdf   :  { %4208 = vmatprep.subr.bf16.mxu1 %v4675_v42  ;;  %v4735_v42 = vld [vmem:[#allocation5 + $0x6f0] sm:$0xff]  }
  0xe0   :  { %4187 = vmatpush3.bf16.msra.mxu0 %v4674_v41  ;;  %v4734_v41 = vld [vmem:[#allocation5 + $0x630] sm:$0xff]  }
  0xe1   :  { %4188 = vmatprep.subr.bf16.mxu0 %v4677_v44  ;;  %v4737_v44 = vld [vmem:[#allocation5 + $0x668] sm:$0xff]  }
  0xe2   :  { %4209 = vmatpush3.bf16.msra.mxu1 %v4676_v43  ;;  %v4736_v43 = vld [vmem:[#allocation5 + $0x6b0] sm:$0xff]  }
  0xe3   :  { %4210 = vmatprep.subr.bf16.mxu1 %v4679_v46  ;;  %v4739_v46 = vld [vmem:[#allocation5 + $0x6e8] sm:$0xff]  }
  0xe4   :  { %4189 = vmatpush3.bf16.msra.mxu0 %v4678_v45  ;;  %v4738_v45 = vld [vmem:[#allocation5 + $0x628] sm:$0xff]  }
  0xe5   :  { %4190 = vmatprep.subr.bf16.mxu0 %v4681_v48  ;;  %v4741_v48 = vld [vmem:[#allocation5 + $0x660] sm:$0xff]  }
  0xe6   :  { %4211 = vmatpush3.bf16.msra.mxu1 %v4680_v47  ;;  %v4740_v47 = vld [vmem:[#allocation5 + $0x6a8] sm:$0xff]  }
  0xe7   :  { %4212 = vmatprep.subr.bf16.mxu1 %v4683_v50  ;;  %v4743_v50 = vld [vmem:[#allocation5 + $0x6e0] sm:$0xff]  }
  0xe8   :  { %4191 = vmatpush3.bf16.msra.mxu0 %v4682_v49  ;;  %v4742_v49 = vld [vmem:[#allocation5 + $0x620] sm:$0xff]  }
  0xe9   :  { %4192 = vmatprep.subr.bf16.mxu0 %v4685_v52  ;;  %v4745_v52 = vld [vmem:[#allocation5 + $0x658] sm:$0xff]  }
  0xea   :  { %4213 = vmatpush3.bf16.msra.mxu1 %v4684_v51  ;;  %v4744_v51 = vld [vmem:[#allocation5 + $0x6a0] sm:$0xff]  }
  0xeb   :  { %4214 = vmatprep.subr.bf16.mxu1 %v4687_v54  ;;  %v4747_v54 = vld [vmem:[#allocation5 + $0x6d8] sm:$0xff]  }
  0xec   :  { %4193 = vmatpush3.bf16.msra.mxu0 %v4686_v53  ;;  %v4746_v53 = vld [vmem:[#allocation5 + $0x618] sm:$0xff]  }
  0xed   :  { %4222 = vmatprep.subr.bf16.mxu0 %v4691_v59  ;;  %v4752_v59 = vld [vmem:[#allocation5 + $0x690] sm:$0xff]  }
  0xee   :  { %4215 = vmatpush3.bf16.msra.mxu1 %v4690_v58  ;;  %v4751_v58 = vld [vmem:[#allocation5 + $0x6d0] sm:$0xff]  }
  0xef   :  { %3046 = vmatmul.mubr.bf16.vlgmr.msra.gmra.mxu0 %v3673_v56  ;;  %4244 = vmatprep.subr.bf16.mxu1 %v4695_v0  ;;  %v4749_v56 = vld [vmem:[#allocation5 + $0x650] sm:$0xff]   ;;  %v4757_v0 = vld [vmem:[#allocation5 + $0x640] sm:$0xff]  }
  0xf0   :  { %4223 = vmatpush3.bf16.msra.mxu0 %v4694_v63  ;;  %3125 = vmatprep.mubr.bf16.mxu0 %v3678_v31  ;;  %v4756_v63 = vld [vmem:[#allocation5 + $0x688] sm:$0xff]  }
  0xf1   :  { %3086 = vmatmul.mubr.bf16.vlgmr.msra.gmra.mxu1 %v3675_v61  ;;  %4224 = vmatprep.subr.bf16.mxu0 %v4697_v2  ;;  %v4754_v61 = vld [vmem:[#allocation5 + $0x608] sm:$0xff]   ;;  %v4759_v2 = vld [vmem:[#allocation5 + $0x6c0] sm:$0xff]  }
  0xf2   :  { %4245 = vmatpush3.bf16.msra.mxu1 %v4696_v1  ;;  %3165 = vmatprep.mubr.bf16.mxu1 %v3680_v36  ;;  %v4758_v1 = vld [vmem:[#allocation5 + $0x600] sm:$0xff]   ;;  %v4773_v31 = vld [vmem:[#allocation5 + $0x768] sm:$0xff]  }
  0xf3   :  { %4246 = vmatprep.subr.bf16.mxu1 %v4699_v4  ;;  %v4778_v36 = vld [vmem:[#allocation5 + $0x720] sm:$0xff]  }
  0xf4   :  { %4225 = vmatpush3.bf16.msra.mxu0 %v4698_v3  ;;  %v114_v3 = vld [vmem:[#allocation2 + $0x60] sm:$0xff] }
  0xf5   :  { %4226 = vmatprep.subr.bf16.mxu0 %v4701_v6  ;;  %v3682_v6 = vcombine.high %v114_v3, %v114_v3 }
  0xf6   :  { %4247 = vmatpush3.bf16.msra.mxu1 %v4700_v5  ;;  %v3681_v5 = vcombine.low %v114_v3, %v114_v3 }
  0xf7   :  { %4248 = vmatprep.subr.bf16.mxu1 %v4703_v8  ;;  %v4763_v8 = vld [vmem:[#allocation5 + $0x778] sm:$0xff]  }
  0xf8   :  { %4227 = vmatpush3.bf16.msra.mxu0 %v4702_v7  ;;  %v4762_v7 = vld [vmem:[#allocation5 + $0x680] sm:$0xff]  }
  0xf9   :  { %4228 = vmatprep.subr.bf16.mxu0 %v4705_v10 }
  0xfa   :  { %4249 = vmatpush3.bf16.msra.mxu1 %v4704_v9  ;;  %v115_v9 = vld [vmem:[#allocation2 + $0x68] sm:$0xff] }
  0xfb   :  { %4250 = vmatprep.subr.bf16.mxu1 %v4707_v12  ;;  %v3683_v12 = vcombine.low %v115_v9, %v115_v9 }
  0xfc   :  { %4229 = vmatpush3.bf16.msra.mxu0 %v4706_v11 }
  0xfd   :  { %4230 = vmatprep.subr.bf16.mxu0 %v4709_v14  ;;  %v4766_v14 = vld [vmem:[#allocation5 + $0x738] sm:$0xff]  }
  0xfe   :  { %4251 = vmatpush3.bf16.msra.mxu1 %v4708_v13  ;;  %v3684_v13 = vcombine.high %v115_v9, %v115_v9 }
  0xff   :  { %4252 = vmatprep.subr.bf16.mxu1 %v4711_v16 }
 0x100   :  { %4231 = vmatpush3.bf16.msra.mxu0 %v4710_v15  ;;  %v3656_v15 = vld [vmem:[#allocation7] ss:$0 sm:$0xff] }
 0x101   :  { %4232 = vmatprep.subr.bf16.mxu0 %v4713_v18 }
 0x102   :  { %4253 = vmatpush3.bf16.msra.mxu1 %v4712_v17  ;;  %v4767_v17 = vld [vmem:[#allocation5 + $0x7f8] sm:$0xff]  }
 0x103   :  { %4254 = vmatprep.subr.bf16.mxu1 %v4715_v20 }
 0x104   :  { %4233 = vmatpush3.bf16.msra.mxu0 %v4714_v19 }
 0x105   :  { %4234 = vmatprep.subr.bf16.mxu0 %v4717_v22 }
 0x106   :  { %4255 = vmatpush3.bf16.msra.mxu1 %v4716_v21  ;;  %v4768_v21 = vld [vmem:[#allocation5 + $0x7b8] sm:$0xff]  }
 0x107   :  { %4256 = vmatprep.subr.bf16.mxu1 %v4719_v24 }
 0x108   :  { %4235 = vmatpush3.bf16.msra.mxu0 %v4718_v23  ;;  %v4769_v23 = vld [vmem:[#allocation5 + $0x770] sm:$0xff]  }
 0x109   :  { %4236 = vmatprep.subr.bf16.mxu0 %v4721_v26 }
 0x10a   :  { %4257 = vmatpush3.bf16.msra.mxu1 %v4720_v25 }
 0x10b   :  { %4258 = vmatprep.subr.bf16.mxu1 %v4723_v28  ;;  %v4771_v28 = vld [vmem:[#allocation5 + $0x7f0] sm:$0xff]  }
 0x10c   :  { %4237 = vmatpush3.bf16.msra.mxu0 %v4722_v27  ;;  %v4770_v27 = vld [vmem:[#allocation5 + $0x730] sm:$0xff]  }
 0x10d   :  { %4266 = vmatprep.subr.bf16.mxu0 %v4727_v33  ;;  %v4775_v33 = vld [vmem:[#allocation5 + $0x7e8] sm:$0xff]  }
 0x10e   :  { %4259 = vmatpush3.bf16.msra.mxu1 %v4726_v32  ;;  %v4774_v32 = vld [vmem:[#allocation5 + $0x728] sm:$0xff]  }
 0x10f   :  { %3126 = vmatmul.mubr.bf16.vlgmr.msra.gmra.mxu0 %v3677_v30  ;;  %4288 = vmatprep.subr.bf16.mxu1 %v4731_v38  ;;  %v4772_v30 = vld [vmem:[#allocation5 + $0x7b0] sm:$0xff]   ;;  %v4780_v38 = vld [vmem:[#allocation5 + $0x7a0] sm:$0xff]  }
 0x110   :  { %4267 = vmatpush3.bf16.msra.mxu0 %v4730_v37  ;;  %3205 = vmatprep.mubr.bf16.mxu0 %v3682_v6  ;;  %v4779_v37 = vld [vmem:[#allocation5 + $0x7e0] sm:$0xff]  }
 0x111   :  { %3166 = vmatmul.mubr.bf16.vlgmr.msra.gmra.mxu1 %v3679_v35  ;;  %4268 = vmatprep.subr.bf16.mxu0 %v4733_v40  ;;  %v4777_v35 = vld [vmem:[#allocation5 + $0x760] sm:$0xff]   ;;  %v4782_v40 = vld [vmem:[#allocation5 + $0x718] sm:$0xff]  }
 0x112   :  { %4289 = vmatpush3.bf16.msra.mxu1 %v4732_v39  ;;  %3245 = vmatprep.mubr.bf16.mxu1 %v3684_v13  ;;  %v4781_v39 = vld [vmem:[#allocation5 + $0x758] sm:$0xff]   ;;  %v4806_v13 = vld [vmem:[#allocation5 + $0x830] sm:$0xff]  }
 0x113   :  { %4290 = vmatprep.subr.bf16.mxu1 %v4735_v42  ;;  %v4784_v42 = vld [vmem:[#allocation5 + $0x798] sm:$0xff]  }
 0x114   :  { %4269 = vmatpush3.bf16.msra.mxu0 %v4734_v41  ;;  %v4783_v41 = vld [vmem:[#allocation5 + $0x7d8] sm:$0xff]  }
 0x115   :  { %4270 = vmatprep.subr.bf16.mxu0 %v4737_v44  ;;  %v4786_v44 = vld [vmem:[#allocation5 + $0x710] sm:$0xff]  }
 0x116   :  { %4291 = vmatpush3.bf16.msra.mxu1 %v4736_v43  ;;  %v4785_v43 = vld [vmem:[#allocation5 + $0x750] sm:$0xff]  }
 0x117   :  { %4292 = vmatprep.subr.bf16.mxu1 %v4739_v46  ;;  %v4788_v46 = vld [vmem:[#allocation5 + $0x790] sm:$0xff]  }
 0x118   :  { %4271 = vmatpush3.bf16.msra.mxu0 %v4738_v45  ;;  %v4787_v45 = vld [vmem:[#allocation5 + $0x7d0] sm:$0xff]  }
 0x119   :  { %4272 = vmatprep.subr.bf16.mxu0 %v4741_v48  ;;  %v4790_v48 = vld [vmem:[#allocation5 + $0x708] sm:$0xff]  }
 0x11a   :  { %4293 = vmatpush3.bf16.msra.mxu1 %v4740_v47  ;;  %v4789_v47 = vld [vmem:[#allocation5 + $0x748] sm:$0xff]  }
 0x11b   :  { %4294 = vmatprep.subr.bf16.mxu1 %v4743_v50  ;;  %v4792_v50 = vld [vmem:[#allocation5 + $0x788] sm:$0xff]  }
 0x11c   :  { %4273 = vmatpush3.bf16.msra.mxu0 %v4742_v49  ;;  %v4791_v49 = vld [vmem:[#allocation5 + $0x7c8] sm:$0xff]  }
 0x11d   :  { %4274 = vmatprep.subr.bf16.mxu0 %v4745_v52  ;;  %v4794_v52 = vld [vmem:[#allocation5 + $0x700] sm:$0xff]  }
 0x11e   :  { %4295 = vmatpush3.bf16.msra.mxu1 %v4744_v51  ;;  %v4793_v51 = vld [vmem:[#allocation5 + $0x740] sm:$0xff]  }
 0x11f   :  { %4296 = vmatprep.subr.bf16.mxu1 %v4747_v54 }
 0x120   :  { %4275 = vmatpush3.bf16.msra.mxu0 %v4746_v53  ;;  %v4795_v53 = vld [vmem:[#allocation5 + $0x7c0] sm:$0xff]  }
 0x121   :  { %4276 = vmatprep.subr.bf16.mxu0 %v4749_v56 }
 0x122   :  { %4297 = vmatpush3.bf16.msra.mxu1 %v4748_v55  ;;  %v116_v55 = vld [vmem:[#allocation2 + $0x70] sm:$0xff] }
 0x123   :  { %4298 = vmatprep.subr.bf16.mxu1 %v4751_v58  ;;  %v3685_v56 = vcombine.low %v116_v55, %v116_v55  ;;  %v4798_v58 = vld [vmem:[#allocation5 + $0x780] sm:$0xff]  }
 0x124   :  { %4277 = vmatpush3.bf16.msra.mxu0 %v4750_v57  ;;  %v3686_v57 = vcombine.high %v116_v55, %v116_v55 }
 0x125   :  { %4278 = vmatprep.subr.bf16.mxu0 %v4753_v60  ;;  %v4799_v60 = vld [vmem:[#allocation5 + $0x878] sm:$0xff]  }
 0x126   :  { %4299 = vmatpush3.bf16.msra.mxu1 %v4752_v59 }
 0x127   :  { %4300 = vmatprep.subr.bf16.mxu1 %v4755_v62 }
 0x128   :  { %4279 = vmatpush3.bf16.msra.mxu0 %v4754_v61  ;;  %v117_v61 = vld [vmem:[#allocation2 + $0x78] sm:$0xff] }
 0x129   :  { %4280 = vmatprep.subr.bf16.mxu0 %v4757_v0  ;;  %v3687_v0 = vcombine.low %v117_v61, %v117_v61 }
 0x12a   :  { %4301 = vmatpush3.bf16.msra.mxu1 %v4756_v63 }
 0x12b   :  { %4302 = vmatprep.subr.bf16.mxu1 %v4759_v2  ;;  %v4802_v2 = vld [vmem:[#allocation5 + $0x838] sm:$0xff]  }
 0x12c   :  { %4281 = vmatpush3.bf16.msra.mxu0 %v4758_v1  ;;  %v3688_v1 = vcombine.high %v117_v61, %v117_v61 }
 0x12d   :  { %4310 = vmatprep.subr.bf16.mxu0 %v4763_v8 }
 0x12e   :  { %4303 = vmatpush3.bf16.msra.mxu1 %v4762_v7  ;;  %v4804_v7 = vld [vmem:[#allocation5 + $0x8b8] sm:$0xff]  }
 0x12f   :  { %v4018_v4 = vpop.f32.mrf.mxu0  ;;  %3206 = vmatmul.mubr.bf16.vlgmr.msra.gmra.mxu0 %v3681_v5  ;;  %4332 = vmatprep.subr.bf16.mxu1 %v4767_v17  ;;  %v4803_v5 = vld [vmem:[#allocation5 + $0x8f8] sm:$0xff]   ;;  %v4809_v17 = vld [vmem:[#allocation5 + $0x868] sm:$0xff]  }
 0x130   :  { %4311 = vmatpush3.bf16.msra.mxu0 %v4766_v14  ;;  %3285 = vmatprep.mubr.bf16.mxu0 %v3686_v57  ;;  %v4807_v14 = vld [vmem:[#allocation5 + $0x8f0] sm:$0xff]  }
 0x131   :  { %v4019_v10 = vpop.f32.mrf.mxu0  ;;  %v4040_v11 = vpop.f32.mrf.mxu1  ;;  %3246 = vmatmul.mubr.bf16.vlgmr.msra.gmra.mxu1 %v3683_v12  ;;  %4312 = vmatprep.subr.bf16.mxu0 %v4769_v23  ;;  %v4815_v23 = vld [vmem:[#allocation5 + $0x8e0] sm:$0xff]   ;;  %v4839_v57 = vld [vmem:[#allocation5 + $0x970] sm:$0xff]  }
 0x132   :  { %v4020_v16 = vadd.f32 %v4019_v10, %v4018_v4  ;;  %4333 = vmatpush3.bf16.msra.mxu1 %v4768_v21  ;;  %3325 = vmatprep.mubr.bf16.mxu1 %v3688_v1  ;;  %v4805_v10 = vld [vmem:[#allocation5 + $0x870] sm:$0xff]   ;;  %v4813_v21 = vld [vmem:[#allocation5 + $0x860] sm:$0xff]  }
 0x133   :  { %v4021_v18 = vpop.f32.mrf.mxu0  ;;  %v4041_v19 = vpop.f32.mrf.mxu1  ;;  %4334 = vmatprep.subr.bf16.mxu1 %v4771_v28  ;;  %v4820_v28 = vld [vmem:[#allocation5 + $0x898] sm:$0xff]   ;;  %v4843_v1 = vld [vmem:[#allocation5 + $0x960] sm:$0xff]  }
 0x134   :  { %v2728_v20 = vadd.f32 %v4020_v16, %v3656_v15  ;;  %v4042_v22 = vadd.f32 %v4041_v19, %v4040_v11  ;;  %4313 = vmatpush3.bf16.msra.mxu0 %v4770_v27  ;;  %v4808_v16 = vld [vmem:[#allocation5 + $0x8b0] sm:$0xff]   ;;  %v4810_v18 = vld [vmem:[#allocation5 + $0x828] sm:$0xff]   ;;  %v4819_v27 = vld [vmem:[#allocation5 + $0x8d8] sm:$0xff]  }
 0x135   :  { %v4022_v24 = vpop.f32.mrf.mxu0  ;;  %v4043_v25 = vpop.f32.mrf.mxu1  ;;  %4314 = vmatprep.subr.bf16.mxu0 %v4773_v31  ;;  %v4811_v19 = vld [vmem:[#allocation5 + $0x8e8] sm:$0xff]   ;;  %v4823_v31 = vld [vmem:[#allocation5 + $0x8d0] sm:$0xff]  }
 0x136   :  { %v5076_v26 = vadd.f32 %v4042_v22, %v2728_v20  ;;  %4335 = vmatpush3.bf16.msra.mxu1 %v4772_v30  ;;  %v4812_v20 = vld [vmem:[#allocation5 + $0x8a8] sm:$0xff]   ;;  %v4814_v22 = vld [vmem:[#allocation5 + $0x820] sm:$0xff]   ;;  %v4817_v25 = vld [vmem:[#allocation5 + $0x858] sm:$0xff]  }
 0x137   :  { %v4044_v29 = vpop.f32.mrf.mxu1  ;;  %4336 = vmatprep.subr.bf16.mxu1 %v4775_v33  ;;  %v4816_v24 = vld [vmem:[#allocation5 + $0x8a0] sm:$0xff]   ;;  %v4822_v30 = vld [vmem:[#allocation5 + $0x810] sm:$0xff]   ;;  %v4825_v33 = vld [vmem:[#allocation5 + $0x848] sm:$0xff]  }
 0x138   :  { %4315 = vmatpush3.bf16.msra.mxu0 %v4774_v32  ;;  %v4821_v29 = vld [vmem:[#allocation5 + $0x850] sm:$0xff]  }
 0x139   :  { %4316 = vmatprep.subr.bf16.mxu0 %v4777_v35  ;;  %v4824_v32 = vld [vmem:[#allocation5 + $0x890] sm:$0xff]   ;;  %v4827_v35 = vld [vmem:[#allocation5 + $0x8c8] sm:$0xff]  }
 0x13a   :  { %4337 = vmatpush3.bf16.msra.mxu1 %v4776_v34  ;;  %v4826_v34 = vld [vmem:[#allocation5 + $0x808] sm:$0xff]  }
 0x13b   :  { %4338 = vmatprep.subr.bf16.mxu1 %v4779_v37  ;;  %v4829_v37 = vld [vmem:[#allocation5 + $0x840] sm:$0xff]  }
 0x13c   :  { %4317 = vmatpush3.bf16.msra.mxu0 %v4778_v36  ;;  %v4828_v36 = vld [vmem:[#allocation5 + $0x888] sm:$0xff]  }
 0x13d   :  { %4318 = vmatprep.subr.bf16.mxu0 %v4781_v39  ;;  %v4831_v39 = vld [vmem:[#allocation5 + $0x8c0] sm:$0xff]  }
 0x13e   :  { %4339 = vmatpush3.bf16.msra.mxu1 %v4780_v38  ;;  %v4830_v38 = vld [vmem:[#allocation5 + $0x800] sm:$0xff]  }
 0x13f   :  { %4340 = vmatprep.subr.bf16.mxu1 %v4783_v41 }
 0x140   :  { %4319 = vmatpush3.bf16.msra.mxu0 %v4782_v40  ;;  %v118_v40 = vld [vmem:[#allocation2 + $0x80] sm:$0xff] }
 0x141   :  { %4320 = vmatprep.subr.bf16.mxu0 %v4785_v43  ;;  %v3690_v43 = vcombine.high %v118_v40, %v118_v40 }
 0x142   :  { %4341 = vmatpush3.bf16.msra.mxu1 %v4784_v42  ;;  %v3689_v42 = vcombine.low %v118_v40, %v118_v40  ;;  %v3468_v40 = vld [vmem:[%s5162_s3 + $0x70] sm:$0xff] }
 0x143   :  { %4342 = vmatprep.subr.bf16.mxu1 %v4787_v45  ;;  %v4835_v45 = vld [vmem:[#allocation5 + $0x978] sm:$0xff]  }
 0x144   :  { %4321 = vmatpush3.bf16.msra.mxu0 %v4786_v44  ;;  %v4834_v44 = vld [vmem:[#allocation5 + $0x880] sm:$0xff]  }
 0x145   :  { %4322 = vmatprep.subr.bf16.mxu0 %v4789_v47 }
 0x146   :  { %4343 = vmatpush3.bf16.msra.mxu1 %v4788_v46 }
 0x147   :  { %4344 = vmatprep.subr.bf16.mxu1 %v4791_v49 }
 0x148   :  { %4323 = vmatpush3.bf16.msra.mxu0 %v4790_v48  ;;  %v119_v48 = vld [vmem:[#allocation2 + $0x88] sm:$0xff] }
 0x149   :  { %4324 = vmatprep.subr.bf16.mxu0 %v4793_v51  ;;  %v3692_v51 = vcombine.high %v119_v48, %v119_v48 }
 0x14a   :  { %4345 = vmatpush3.bf16.msra.mxu1 %v4792_v50  ;;  %v3691_v50 = vcombine.low %v119_v48, %v119_v48  ;;  %v3460_v48 = vld [vmem:[%s5162_s3 + $0x30] sm:$0xff] }
 0x14b   :  { %4346 = vmatprep.subr.bf16.mxu1 %v4795_v53 }
 0x14c   :  { %4325 = vmatpush3.bf16.msra.mxu0 %v4794_v52  ;;  %v4838_v52 = vld [vmem:[#allocation5 + $0x938] sm:$0xff]  }
 0x14d   :  { %4354 = vmatprep.subr.bf16.mxu0 %v4799_v60 }
 0x14e   :  { %4347 = vmatpush3.bf16.msra.mxu1 %v4798_v58  ;;  %v4840_v58 = vld [vmem:[#allocation5 + $0x930] sm:$0xff]  }
 0x14f   :  { %v4062_v54 = vpop.f32.mrf.mxu0  ;;  %3286 = vmatmul.mubr.bf16.vlgmr.msra.gmra.mxu0 %v3685_v56  ;;  %4376 = vmatprep.subr.bf16.mxu1 %v4803_v5  ;;  %v120_v5 = vld [vmem:[#allocation2 + $0x90] sm:$0xff] }
 0x150   :  { %4355 = vmatpush3.bf16.msra.mxu0 %v4802_v2  ;;  %3365 = vmatprep.mubr.bf16.mxu0 %v3690_v43  ;;  %v4844_v2 = vld [vmem:[#allocation5 + $0x920] sm:$0xff]  }
 0x151   :  { %v4063_v59 = vpop.f32.mrf.mxu0  ;;  %v4084_v63 = vpop.f32.mrf.mxu1  ;;  %3326 = vmatmul.mubr.bf16.vlgmr.msra.gmra.mxu1 %v3687_v0  ;;  %4356 = vmatprep.subr.bf16.mxu0 %v4805_v10  ;;  %v4842_v0 = vld [vmem:[#allocation5 + $0x928] sm:$0xff]   ;;  %v3465_v43 = vld [vmem:[%s5162_s3 + $0x58] sm:$0xff] }
 0x152   :  { %v4064_v62 = vadd.f32 %v4063_v59, %v4062_v54  ;;  %4377 = vmatpush3.bf16.msra.mxu1 %v4804_v7  ;;  %3405 = vmatprep.mubr.bf16.mxu1 %v3692_v51  ;;  %v3694_v7 = vcombine.high %v120_v5, %v120_v5  ;;  %v4850_v10 = vld [vmem:[#allocation5 + $0x908] sm:$0xff]  }
 0x153   :  { %v4065_v3 = vpop.f32.mrf.mxu0  ;;  %v4085_v6 = vpop.f32.mrf.mxu1  ;;  %4378 = vmatprep.subr.bf16.mxu1 %v4807_v14 }
 0x154   :  { %v2808_v4 = vadd.f32 %v4064_v62, %v5076_v26  ;;  %v4086_v8 = vadd.f32 %v4085_v6, %v4084_v63  ;;  %4357 = vmatpush3.bf16.msra.mxu0 %v4806_v13  ;;  %v4818_v26 = vld [vmem:[#allocation5 + $0x818] sm:$0xff]   ;;  %v4841_v62 = vld [vmem:[#allocation5 + $0x968] sm:$0xff]   ;;  %v4847_v6 = vld [vmem:[#allocation5 + $0x950] sm:$0xff]   ;;  %v3693_v13 = vcombine.low %v120_v5, %v120_v5 }
 0x155   :  { %v4066_v9 = vpop.f32.mrf.mxu0  ;;  %v4087_v11 = vpop.f32.mrf.mxu1  ;;  %4358 = vmatprep.subr.bf16.mxu0 %v4809_v17  ;;  %v4845_v3 = vld [vmem:[#allocation5 + $0x958] sm:$0xff]   ;;  %v3553_v5 = vld [vmem:[#allocation10 + $0x28] sm:$0xff] }
 0x156   :  { %v5079_v12 = vadd.f32 %v4086_v8, %v2808_v4  ;;  %4379 = vmatpush3.bf16.msra.mxu1 %v4808_v16  ;;  %v4846_v4 = vld [vmem:[#allocation5 + $0x918] sm:$0xff]   ;;  %v4848_v8 = vld [vmem:[#allocation5 + $0x910] sm:$0xff]   ;;  %v4849_v9 = vld [vmem:[#allocation5 + $0x948] sm:$0xff]  }
 0x157   :  { %v4088_v15 = vpop.f32.mrf.mxu1  ;;  %4380 = vmatprep.subr.bf16.mxu1 %v4811_v19  ;;  %v4851_v11 = vld [vmem:[#allocation5 + $0x940] sm:$0xff]  }
 0x158   :  { %4359 = vmatpush3.bf16.msra.mxu0 %v4810_v18 }
 0x159   :  { %4360 = vmatprep.subr.bf16.mxu0 %v4813_v21 }
 0x15a   :  { %4381 = vmatpush3.bf16.msra.mxu1 %v4812_v20 }
 0x15b   :  { %4382 = vmatprep.subr.bf16.mxu1 %v4815_v23 }
 0x15c   :  { %4361 = vmatpush3.bf16.msra.mxu0 %v4814_v22 }
 0x15d   :  { %4362 = vmatprep.subr.bf16.mxu0 %v4817_v25 }
 0x15e   :  { %4383 = vmatpush3.bf16.msra.mxu1 %v4816_v24 }
 0x15f   :  { %4384 = vmatprep.subr.bf16.mxu1 %v4819_v27 }
 0x160   :  { %4363 = vmatpush3.bf16.msra.mxu0 %v4818_v26 }
 0x161   :  { %4364 = vmatprep.subr.bf16.mxu0 %v4821_v29 }
 0x162   :  { %4385 = vmatpush3.bf16.msra.mxu1 %v4820_v28 }
 0x163   :  { %4386 = vmatprep.subr.bf16.mxu1 %v4823_v31 }
 0x164   :  { %4365 = vmatpush3.bf16.msra.mxu0 %v4822_v30 }
 0x165   :  { %4366 = vmatprep.subr.bf16.mxu0 %v4825_v33 }
 0x166   :  { %4387 = vmatpush3.bf16.msra.mxu1 %v4824_v32 }
 0x167   :  { %4388 = vmatprep.subr.bf16.mxu1 %v4827_v35 }
 0x168   :  { %4367 = vmatpush3.bf16.msra.mxu0 %v4826_v34 }
 0x169   :  { %4368 = vmatprep.subr.bf16.mxu0 %v4829_v37 }
 0x16a   :  { %4389 = vmatpush3.bf16.msra.mxu1 %v4828_v36 }
 0x16b   :  { %4390 = vmatprep.subr.bf16.mxu1 %v4831_v39  ;;  %v5015_v39 = vmov 0.0  }
 0x16c   :  { %4369 = vmatpush3.bf16.msra.mxu0 %v4830_v38  ;;  %v3469_v38 = vld [vmem:[%s5162_s3 + $0x78] sm:$0xff] }
 0x16d   :  { %4398 = vmatprep.subr.bf16.mxu0 %v4835_v45  ;;  %v3463_v45 = vld [vmem:[%s5162_s3 + $0x48] sm:$0xff] }
 0x16e   :  { %4391 = vmatpush3.bf16.msra.mxu1 %v4834_v44  ;;  %v3464_v44 = vld [vmem:[%s5162_s3 + $0x50] sm:$0xff] }
 0x16f   :  { %v4106_v41 = vpop.f32.mrf.mxu0  ;;  %3366 = vmatmul.mubr.bf16.vlgmr.msra.gmra.mxu0 %v3689_v42  ;;  %4446 = vmatprep.subr.mxu1 %v5015_v39  ;;  %v3466_v42 = vld [vmem:[%s5162_s3 + $0x60] sm:$0xff] }
 0x170   :  { %4399 = vmatpush3.bf16.msra.mxu0 %v4838_v52  ;;  %3445 = vmatprep.mubr.bf16.mxu0 %v3694_v7  ;;  %v3551_v7 = vld [vmem:[#allocation10 + $0x18] sm:$0xff] }
 0x171   :  { %v4107_v46 = vpop.f32.mrf.mxu0  ;;  %v4128_v47 = vpop.f32.mrf.mxu1  ;;  %3406 = vmatmul.mubr.bf16.vlgmr.msra.gmra.mxu1 %v3691_v50  ;;  %4400 = vmatprep.subr.bf16.mxu0 %v4839_v57  ;;  %v3457_v57 = vld [vmem:[%s5162_s3 + $0x18] sm:$0xff] }
 0x172   :  { %v4108_v49 = vadd.f32 %v4107_v46, %v4106_v41  ;;  %4447 = vmatpush3.msra.mxu1 %v3469_v38  ;;  %v3467_v41 = vld [vmem:[%s5162_s3 + $0x68] sm:$0xff]  ;;  %v3462_v46 = vld [vmem:[%s5162_s3 + $0x40] sm:$0xff]  ;;  %4478 = vmatprep.mubr.msk.f32.mxu1 %vm5016_vm0, %v5015_v39 }
 0x173   :  { %v4109_v53 = vpop.f32.mrf.mxu0  ;;  %v4129_v54 = vpop.f32.mrf.mxu1  ;;  %4448 = vmatprep.subr.mxu1 %v5015_v39 }
 0x174   :  { %v2888_v55 = vadd.f32 %v4108_v49, %v5079_v12  ;;  %v4130_v56 = vadd.f32 %v4129_v54, %v4128_v47  ;;  %4401 = vmatpush3.bf16.msra.mxu0 %v4840_v58  ;;  %v4852_v12 = vld [vmem:[#allocation5 + $0x900] sm:$0xff]   ;;  %4449 = vmatpush3.msra.mxu1 %v3468_v40  ;;  %v3459_v49 = vld [vmem:[%s5162_s3 + $0x28] sm:$0xff]  ;;  %v3458_v53 = vld [vmem:[%s5162_s3 + $0x20] sm:$0xff] }
 0x175   :  { %v4110_v59 = vpop.f32.mrf.mxu0  ;;  %v4131_v60 = vpop.f32.mrf.mxu1  ;;  %4402 = vmatprep.subr.bf16.mxu0 %v4841_v62  ;;  %4450 = vmatprep.subr.mxu1 %v5015_v39  ;;  %v3461_v47 = vld [vmem:[%s5162_s3 + $0x38] sm:$0xff]  ;;  %v3456_v62 = vld [vmem:[%s5162_s3 + $0x10] sm:$0xff] }
 0x176   :  { %v2928_v61 = vadd.f32 %v4130_v56, %v2888_v55  ;;  %4451 = vmatpush3.msra.mxu1 %v3467_v41 }
 0x177   :  { %v4132_v63 = vpop.f32.mrf.mxu1  ;;  %4452 = vmatprep.subr.mxu1 %v5015_v39 }
 0x178   :  { %4403 = vmatpush3.bf16.msra.mxu0 %v4842_v0  ;;  %4453 = vmatpush3.msra.mxu1 %v3466_v42 }
 0x179   :  { %4404 = vmatprep.subr.bf16.mxu0 %v4843_v1  ;;  %4454 = vmatprep.subr.mxu1 %v5015_v39  ;;  %v3455_v1 = vld [vmem:[%s5162_s3 + $0x8] sm:$0xff] }
 0x17a   :  { %4455 = vmatpush3.msra.mxu1 %v3465_v43 }
 0x17b   :  { %4456 = vmatprep.subr.mxu1 %v5015_v39 }
 0x17c   :  { %4405 = vmatpush3.bf16.msra.mxu0 %v4844_v2  ;;  %4457 = vmatpush3.msra.mxu1 %v3464_v44  ;;  %v3454_v2 = vld [vmem:[%s5162_s3] sm:$0xff]  ;;  %s5017_s3 = smov [#allocation13]  }
 0x17d   :  { %4406 = vmatprep.subr.bf16.mxu0 %v4845_v3  ;;  %4458 = vmatprep.subr.mxu1 %v5015_v39  ;;  %v3555_v3 = vld [vmem:[#allocation10 + $0x38] sm:$0xff]  ;;  %s3644_s12 = sshll.u32 %s5017_s3, 4  ;;  %s3645_s12 = int_to_ptr.vmem [resolvable:$true] %s3644_s12 }
 0x17e   :  { %4459 = vmatpush3.msra.mxu1 %v3463_v45  ;;  %s4975_s13 = scalar_lea.vmem %s3645_s12, 128  ;;  %p4980_p3 = scmp.lt.s32.totalorder %s3645_s12, %s3645_s12 }
 0x17f   :  { %4460 = vmatprep.subr.mxu1 %v5015_v39  ;;  %p4976_p2 = scmp.ne.s32.totalorder %s3645_s12, %s4975_s13  ;;  %p4981_p4 = scmp.lt.s32.totalorder %s4975_s13, %s4975_s13 }
 0x180   :  { %4407 = vmatpush3.bf16.msra.mxu0 %v4846_v4  ;;  %4461 = vmatpush3.msra.mxu1 %v3462_v46  ;;  %v3554_v4 = vld [vmem:[#allocation10 + $0x30] sm:$0xff] }
 0x181   :  { %4408 = vmatprep.subr.bf16.mxu0 %v4847_v6  ;;  %4462 = vmatprep.subr.mxu1 %v5015_v39  ;;  %v3552_v6 = vld [vmem:[#allocation10 + $0x20] sm:$0xff]  ;;  %p4982_p5 = por %p4981_p4, %p4980_p3 }
 0x182   :  { %4463 = vmatpush3.msra.mxu1 %v3461_v47 }
 0x183   :  { %4464 = vmatprep.subr.mxu1 %v5015_v39  ;;  %p4983_p6 = pnand %p4982_p5, %p4976_p2 }
 0x184   :  { %4409 = vmatpush3.bf16.msra.mxu0 %v4848_v8  ;;  %4465 = vmatpush3.msra.mxu1 %v3460_v48 }
 0x185   :  { %4410 = vmatprep.subr.bf16.mxu0 %v4849_v9  ;;  %4466 = vmatprep.subr.mxu1 %v5015_v39 }
 0x186   :  { %4467 = vmatpush3.msra.mxu1 %v3459_v49 }
 0x187   :  { %4468 = vmatprep.subr.mxu1 %v5015_v39 }
 0x188   :  { %4411 = vmatpush3.bf16.msra.mxu0 %v4850_v10  ;;  %4469 = vmatpush3.msra.mxu1 %v3458_v53  ;;  %v3549_v53 = vld [vmem:[#allocation10 + $0x8] sm:$0xff] }
 0x189   :  { %4412 = vmatprep.subr.bf16.mxu0 %v4851_v11  ;;  %4470 = vmatprep.subr.mxu1 %v5015_v39 }
 0x18a   :  { %4471 = vmatpush3.msra.mxu1 %v3457_v57 }
 0x18b   :  { %4472 = vmatprep.subr.mxu1 %v5015_v39 }
 0x18c   :  { %4413 = vmatpush3.bf16.msra.mxu0 %v4852_v12  ;;  %4473 = vmatpush3.msra.mxu1 %v3456_v62 }
 0x18d   :  { %4481 = vmatprep.subr.mxu0 %v5015_v39  ;;  %4474 = vmatprep.subr.mxu1 %v5015_v39 }
 0x18e   :  { %4475 = vmatpush3.msra.mxu1 %v3455_v1 }
 0x18f   :  { %v4150_v14 = vpop.f32.mrf.mxu0  ;;  %3446 = vmatmul.mubr.bf16.vlgmr.msra.gmra.mxu0 %v3693_v13  ;;  %4476 = vmatprep.subr.mxu1 %v5015_v39 }
 0x190   :  { %4477 = vmatpush3.msra.mxu1 %v3454_v2  ;;  %4497 = vmatprep.mubr.msk.f32.mxu0 %vm5016_vm0, %v5015_v39 }
 0x191   :  { %v4151_v15 = vpop.f32.mrf.mxu0  ;;  %v4172_v16 = vpop.f32.mrf.mxu1  ;;  %4482 = vmatpush3.msra.mxu0 %v3555_v3 }
 0x192   :  { %v4152_v17 = vadd.f32 %v4151_v15, %v4150_v14  ;;  %4483 = vmatprep.subr.mxu0 %v5015_v39 }
 0x193   :  { %v4153_v18 = vpop.f32.mrf.mxu0  ;;  %v4173_v19 = vpop.f32.mrf.mxu1  ;;  %4484 = vmatpush3.msra.mxu0 %v3554_v4 }
 0x194   :  { %v2968_v20 = vadd.f32 %v4152_v17, %v2928_v61  ;;  %v4174_v21 = vadd.f32 %v4173_v19, %v4172_v16  ;;  %4485 = vmatprep.subr.mxu0 %v5015_v39 }
 0x195   :  { %v4154_v22 = vpop.f32.mrf.mxu0  ;;  %v4175_v23 = vpop.f32.mrf.mxu1  ;;  %4486 = vmatpush3.msra.mxu0 %v3553_v5 }
 0x196   :  { %v3008_v24 = vadd.f32 %v4174_v21, %v2968_v20  ;;  %4487 = vmatprep.subr.mxu0 %v5015_v39 }
 0x197   :  { %v4176_v25 = vpop.f32.mrf.mxu1  ;;  %4488 = vmatpush3.msra.mxu0 %v3552_v6 }
 0x198   :  { %4489 = vmatprep.subr.mxu0 %v5015_v39 }
 0x199   :  { %4490 = vmatpush3.msra.mxu0 %v3551_v7 }
 0x19a   :  { %4491 = vmatprep.subr.mxu0 %v5015_v39 }
 0x1af   :  { %v4194_v26 = vpop.f32.mrf.mxu0 }
 0x1b1   :  { %v4195_v27 = vpop.f32.mrf.mxu0  ;;  %v4216_v29 = vpop.f32.mrf.mxu1 }
 0x1b2   :  { %v4196_v28 = vadd.f32 %v4195_v27, %v4194_v26 }
 0x1b3   :  { %v4197_v30 = vpop.f32.mrf.mxu0  ;;  %v4217_v32 = vpop.f32.mrf.mxu1 }
 0x1b4   :  { %v3048_v31 = vadd.f32 %v4196_v28, %v3008_v24  ;;  %v4218_v33 = vadd.f32 %v4217_v32, %v4216_v29 }
 0x1b5   :  { %v4198_v34 = vpop.f32.mrf.mxu0  ;;  %v4219_v35 = vpop.f32.mrf.mxu1 }
 0x1b6   :  { %v3088_v36 = vadd.f32 %v4218_v33, %v3048_v31 }
 0x1b7   :  { %v4220_v37 = vpop.f32.mrf.mxu1 }
 0x1cf   :  { %v4238_v50 = vpop.f32.mrf.mxu0 }
 0x1d1   :  { %v4239_v51 = vpop.f32.mrf.mxu0  ;;  %v4260_v52 = vpop.f32.mrf.mxu1 }
 0x1d2   :  { %v4240_v54 = vadd.f32 %v4239_v51, %v4238_v50 }
 0x1d3   :  { %v4241_v55 = vpop.f32.mrf.mxu0  ;;  %v4261_v56 = vpop.f32.mrf.mxu1 }
 0x1d4   :  { %v3128_v58 = vadd.f32 %v4240_v54, %v3088_v36  ;;  %v4262_v59 = vadd.f32 %v4261_v56, %v4260_v52  ;;  %v3550_v52 = vld [vmem:[#allocation10 + $0x10] sm:$0xff]  ;;  %v3548_v54 = vld [vmem:[#allocation10] sm:$0xff]  ;;  %v3999_v55 = vld [vmem:[#allocation8] ss:$0 sm:$0xff] }
 0x1d5   :  { %v4242_v60 = vpop.f32.mrf.mxu0  ;;  %v4263_v61 = vpop.f32.mrf.mxu1  ;;  %4492 = vmatpush3.msra.mxu0 %v3550_v52 }
 0x1d6   :  { %v3168_v63 = vadd.f32 %v4262_v59, %v3128_v58  ;;  %4493 = vmatprep.subr.mxu0 %v5015_v39  ;;  %v4000_v60 = vld [vmem:[#allocation11] ss:$0 sm:$0xff] }
 0x1d7   :  { %v4264_v0 = vpop.f32.mrf.mxu1  ;;  %4494 = vmatpush3.msra.mxu0 %v3549_v53 }
 0x1d8   :  { %4495 = vmatprep.subr.mxu0 %v5015_v39 }
 0x1d9   :  { %4496 = vmatpush3.msra.mxu0 %v3548_v54 }
 0x1ef   :  { %v4282_v8 = vpop.f32.mrf.mxu0 }
 0x1f1   :  { %v4283_v9 = vpop.f32.mrf.mxu0  ;;  %v4304_v10 = vpop.f32.mrf.mxu1 }
 0x1f2   :  { %v4284_v11 = vadd.f32 %v4283_v9, %v4282_v8 }
 0x1f3   :  { %v4285_v12 = vpop.f32.mrf.mxu0  ;;  %v4305_v13 = vpop.f32.mrf.mxu1 }
 0x1f4   :  { %v3208_v14 = vadd.f32 %v4284_v11, %v3168_v63  ;;  %v4306_v15 = vadd.f32 %v4305_v13, %v4304_v10 }
 0x1f5   :  { %v4286_v16 = vpop.f32.mrf.mxu0  ;;  %v4307_v17 = vpop.f32.mrf.mxu1 }
 0x1f6   :  { %v3248_v18 = vadd.f32 %v4306_v15, %v3208_v14 }
 0x1f7   :  { %v4308_v19 = vpop.f32.mrf.mxu1 }
 0x20f   :  { %v4326_v20 = vpop.f32.mrf.mxu0 }
 0x211   :  { %v4327_v21 = vpop.f32.mrf.mxu0  ;;  %v4348_v22 = vpop.f32.mrf.mxu1 }
 0x212   :  { %v4328_v36 = vadd.f32 %v4327_v21, %v4326_v20 }
 0x213   :  { %v4329_v23 = vpop.f32.mrf.mxu0  ;;  %v4349_v24 = vpop.f32.mrf.mxu1 }
 0x214   :  { %v3288_v37 = vadd.f32 %v4328_v36, %v3248_v18  ;;  %v4350_v38 = vadd.f32 %v4349_v24, %v4348_v22 }
 0x215   :  { %v4330_v25 = vpop.f32.mrf.mxu0  ;;  %v4351_v26 = vpop.f32.mrf.mxu1 }
 0x216   :  { %v3328_v41 = vadd.f32 %v4350_v38, %v3288_v37 }
 0x217   :  { %v4352_v27 = vpop.f32.mrf.mxu1 }
 0x22f   :  { %v4370_v28 = vpop.f32.mrf.mxu0 }
 0x231   :  { %v4371_v29 = vpop.f32.mrf.mxu0  ;;  %v4392_v30 = vpop.f32.mrf.mxu1 }
 0x232   :  { %v4372_v40 = vadd.f32 %v4371_v29, %v4370_v28 }
 0x233   :  { %v4373_v31 = vpop.f32.mrf.mxu0  ;;  %v4393_v32 = vpop.f32.mrf.mxu1 }
 0x234   :  { %v3368_v42 = vadd.f32 %v4372_v40, %v3328_v41  ;;  %v4394_v43 = vadd.f32 %v4393_v32, %v4392_v30 }
 0x235   :  { %v4374_v33 = vpop.f32.mrf.mxu0  ;;  %v4395_v34 = vpop.f32.mrf.mxu1 }
 0x236   :  { %v3408_v46 = vadd.f32 %v4394_v43, %v3368_v42 }
 0x237   :  { %v4396_v35 = vpop.f32.mrf.mxu1 }
 0x24f   :  { %v4414_v44 = vpop.f32.mrf.mxu0 }
 0x251   :  { %v4415_v45 = vpop.f32.mrf.mxu0 }
 0x252   :  { %v4416_v47 = vadd.f32 %v4415_v45, %v4414_v44 }
 0x253   :  { %v4417_v48 = vpop.f32.mrf.mxu0 }
 0x254   :  { %v3448_v49 = vadd.f32 %v4416_v47, %v3408_v46 }
 0x255   :  { %v4418_v50 = vpop.f32.mrf.mxu0 }
 0x256   :  { %v3453_v51 = vmax.f32 %v3448_v49, 0.0 }
 0x258   :  { %4479 = vmatmul.mubr.f32.vlgmr.msra.gmra.mxu1 %v3453_v51 }
 0x318   :  { %v3543_v56 = vpop.f32.mrf.mxu1 }
 0x319   :  { %v3544_v57 = vadd.f32 %v3999_v55, %v3543_v56 }
 0x31a   :  { %v4480_v58 = vpop.f32.mrf.mxu1 }
 0x31b   :  { %v3547_v59 = vmax.f32 %v3544_v57, 0.0 }
 0x31d   :  { %4498 = vmatmul.mubr.msk.f32.vlgmr.msra.gmra.mxu0 %vm3563_vm1, %v3547_v59 }
 0x3dd   :  { %v3633_v61 = vpop.f32.mrf.mxu0 }
 0x3de   :  { %v3634_v62 = vadd.f32 %v4000_v60, %v3633_v61 }
 0x3df   :  { %v4499_v63 = vpop.f32.mrf.mxu0 }
 0x3e0   :  { %3637 = vst [vmem:[#allocation13] sm:$0xff] %v3634_v62 }
 0x3e1   :  { %4986 = shalt.err (!%p4983_p6)
}
 0x3e2   :  { %3647 = dma.vmem_to_hbm [thread:$0]  %s3645_s12, 128, %s5166_s7, [#allocation4]  }
 0x3e3   :  { %5003 = dma.done.wait [#allocation4], 128  }
 0x3e4   :  { %5004 = vsyncadd [#allocation4], 4294967168 }
 0x3e5   :  { %3651 = vsyncpa [#allocation3], 1 }
 0x3e6   :  { %3652 = vsyncpa [#allocation6], 1 }
 0x3e7   :  { %3653 = vsyncpa [#allocation9], 1 }
 0x3e8   :  { %3654 = vsyncpa [#allocation12], 1 }
 0x3e9   :  { %3655 = vsyncpa [#allocation4], 1 }

</bundles_post_ra>
